<compile_context>
chip_gen: v6e
topology: v6e:2x2x1
jax: 0.10.0
libtpu: 0.0.40
codegen_flags: <defaults>
</compile_context>

<pallas_src>
import jax
import jax.numpy as jnp
from jax.experimental import pallas as pl
from jax.experimental.pallas import tpu as pltpu

# ----------------------------- static config -----------------------------
N_NODES = 12                 # AU graph nodes (192 = 12 * 16)
NFEAT = 2
NHID = 16
NOUT = 16
NUM_HEADS = 4
HEAD_DIM = NOUT // NUM_HEADS
XDIM = N_NODES * NFEAT       # 24  (flattened node*feature input)
GDIM = N_NODES * NOUT        # 192 (flattened node*channel activation)
HID = 64
N_CLS = 3 + 3 + 2 + 2        # 10
BN_EPS = 1e-5

# ResidualWeight alphas: nn.Parameter(0.5) clamped to [0, 1] -> 0.5
GC_ALPHA = 0.5
GAT_ALPHA = 0.5
TCN_ALPHA = 0.5


# =========================== Pallas kernel 1 =============================
# Whole graph embedding (GCN + BN + ReLU + multi-head GAT + TCN-over-nodes),
# expressed as 4 lane-dense 2-D matmuls on (Mt, 24)/(Mt, 192) tiles.
def graph_kernel(x_ref, wsmall_ref, wbig_ref, vec_ref, o_ref):
    x = x_ref[...]                               # (Mt, 24)
    vecs = vec_ref[...]                          # (4, 192) packed per-channel vectors
    b_gc, bn1_s, bn1_b, b_tcn = (vecs[0:1], vecs[1:2], vecs[2:3], vecs[3:4])

    # GraphConvolution: relu(adj @ (x@W) + b), residual Linear(2->16), 0.5/0.5 mix
    out = jnp.dot(x, wsmall_ref[0], preferred_element_type=jnp.float32) + b_gc
    res = jnp.dot(x, wsmall_ref[1], preferred_element_type=jnp.float32)
    h = GC_ALPHA * jnp.maximum(out, 0.0) + (1.0 - GC_ALPHA) * res      # (Mt, 192)

    # bn1 (eval, folded) + ReLU
    h = jnp.maximum(h * bn1_s + bn1_b, 0.0)

    # Multi-head GAT (attention reduces to identity in the reference) + residual mix,
    # folded into one (192,192) matmul.
    h2 = jnp.dot(h, wbig_ref[0], preferred_element_type=jnp.float32)

    # TCNBlock over the node axis: banded (192,192) matmul (BN scale folded) + bias,
    # ReLU, dropout=identity, residual mix.
    y = jnp.dot(h2, wbig_ref[1], preferred_element_type=jnp.float32) + b_tcn
    y = jnp.maximum(y, 0.0)
    o_ref[...] = TCN_ALPHA * y + (1.0 - TCN_ALPHA) * h2


# =========================== Pallas kernel 2 =============================
# Conv1d head: Conv(192,64,k1)+BN+ReLU, Conv(64,64,k3,p1)+BN+ReLU,
# 2x Conv(64,64,k3,p2,d2)+BN+ReLU, Conv(64,10,k3,p2,d2).
# k=3 convs use K-stacking: one (T,192) @ (192,Cout) matmul per layer.
def _stack_taps(x, d):
    # x: (T, C). Returns (T, 3C) columns = [x[n-d] | x[n] | x[n+d]] with zero fill.
    t, c = x.shape
    z = jnp.zeros((d, c), x.dtype)
    down = jnp.concatenate([z, x[: t - d]], axis=0)      # row n holds x[n-d]
    up = jnp.concatenate([x[d:], z], axis=0)             # row n holds x[n+d]
    return jnp.concatenate([down, x, up], axis=1)


def temporal_kernel(x_ref, w0_ref, w123_ref, wc_ref, bias_ref, o_ref):
    x = x_ref[0]                                         # (T, 192)
    bias = bias_ref[...]                                 # (4, 64)

    # 1x1 conv (BN scale folded into w0) + ReLU
    y = jnp.maximum(
        jnp.dot(x, w0_ref[...], preferred_element_type=jnp.float32) + bias[0:1], 0.0)

    # three k=3 convs (dilations 1, 2, 2), BN folded, ReLU
    for idx, dil in ((0, 1), (1, 2), (2, 2)):
        y = jnp.maximum(
            jnp.dot(_stack_taps(y, dil), w123_ref[idx],
                    preferred_element_type=jnp.float32) + bias[idx + 1 : idx + 2], 0.0)

    # classification conv (k=3, d=2, no BN / bias)
    o_ref[0] = jnp.dot(_stack_taps(y, 2), wc_ref[...],
                       preferred_element_type=jnp.float32)


# ============================== wrappers =================================
def _bcast_spec(shape):
    zeros = (0,) * len(shape)
    return pl.BlockSpec(shape, lambda *_: zeros)


def _round_up(v, mult):
    return (v + mult - 1) // mult * mult


def graph_embedding_forward(x_flat, p, m_tile=512):
    # x_flat: (M, 24) with M = b*t.  Default m_tile=512 keeps per-step tiles ~1 MiB,
    # comfortably inside v7x's 64 MiB VMEM while amortizing grid-step overhead.
    m = x_flat.shape[0]
    m_tile = _round_up(max(8, min(m_tile, _round_up(m, 8))), 8)
    m_pad = _round_up(m, m_tile)
    if m_pad != m:
        x_flat = jnp.pad(x_flat, ((0, m_pad - m), (0, 0)))
    args = (x_flat, p['w_small'], p['w_big'], p['vecs'])
    in_specs = [pl.BlockSpec((m_tile, XDIM), lambda i: (i, 0))]
    in_specs += [_bcast_spec(a.shape) for a in args[1:]]
    out = pl.pallas_call(
        graph_kernel,
        out_shape=jax.ShapeDtypeStruct((m_pad, GDIM), jnp.float32),
        grid=(m_pad // m_tile,),
        in_specs=in_specs,
        out_specs=pl.BlockSpec((m_tile, GDIM), lambda i: (i, 0)),
        compiler_params=pltpu.CompilerParams(dimension_semantics=("parallel",)),
    )(*args)
    return out[:m]


def head_forward(feats, p):
    b, t, c = feats.shape
    args = (feats, p['w0'], p['w123'], p['wc'], p['bias'])
    in_specs = [pl.BlockSpec((1, t, c), lambda i: (i, 0, 0))]
    in_specs += [_bcast_spec(a.shape) for a in args[1:]]
    return pl.pallas_call(
        temporal_kernel,
        out_shape=jax.ShapeDtypeStruct((b, t, N_CLS), jnp.float32),
        grid=(b,),
        in_specs=in_specs,
        out_specs=pl.BlockSpec((1, t, N_CLS), lambda i: (i, 0, 0)),
        compiler_params=pltpu.CompilerParams(dimension_semantics=("parallel",)),
    )(*args)


def forward(x, params):
    # x: (b, t, n, c), same as the PyTorch module input
    b, t, n, c = x.shape
    x_flat = x.reshape(b * t, n * c)                   # (b*t, 24) node-major, channel-minor
    g = graph_embedding_forward(x_flat, params)        # (b*t, 192) lane-dense
    feats = g.reshape(b, t, GDIM)                      # matches torch reshape(b,t,-1)
    y = head_forward(feats, params)                    # (b, t, 10)
    return jnp.transpose(y, (0, 2, 1))                 # (b, 10, t) == PyTorch NCL


# ============================ parameter init =============================
def _bn_fold(gamma, beta, mean, var):
    scale = gamma / jnp.sqrt(var + BN_EPS)
    return scale, beta - mean * scale


def _kaiming_conv(key, out_c, in_c, k):
    fan_in = in_c * k
    return jax.random.normal(key, (out_c, in_c, k), jnp.float32) * jnp.sqrt(2.0 / fan_in)


def _xavier(key, fan_in, fan_out):
    std = jnp.sqrt(2.0 / (fan_in + fan_out))
    return jax.random.normal(key, (fan_in, fan_out), jnp.float32) * std


def init_params(key):
    ks = jax.random.split(key, 12)
    eye12 = jnp.eye(N_NODES, dtype=jnp.float32)
    eye16 = jnp.eye(NOUT, dtype=jnp.float32)

    # --------------------- raw module parameters (eval mode) ----------------------
    # adjacency: synthetic, row-normalized.  # TODO(synk): real adj from assets/{dataset}.npy
    a = jax.random.uniform(ks[0], (N_NODES, N_NODES)) + eye12
    adj = (a / jnp.sum(a, axis=1, keepdims=True)).astype(jnp.float32)

    stdv = 1.0 / jnp.sqrt(float(NHID))
    gc_w = jax.random.uniform(ks[1], (NFEAT, NHID), minval=-stdv, maxval=stdv)
    gc_b = jax.random.uniform(ks[2], (NHID,), minval=-stdv, maxval=stdv)
    gc_res = _xavier(ks[3], NFEAT, NHID)              # Linear(2,16,bias=False): x @ W^T

    # 4 GAT heads Linear(16 -> 4, bias=False); W_all = [W_0^T | ... | W_3^T]  (16,16)
    head_std = jnp.sqrt(2.0 / (NHID + HEAD_DIM))
    gat_heads = jax.random.normal(ks[4], (NUM_HEADS, NHID, HEAD_DIM), jnp.float32) * head_std
    gat_w = jnp.concatenate([gat_heads[i] for i in range(NUM_HEADS)], axis=1)

    tcn_w = _kaiming_conv(ks[5], NOUT, NOUT, 3)       # torch layout (out, in, k)
    tcn_b = jnp.zeros((NOUT,), jnp.float32)

    # eval-mode BN (gamma=1, beta=0, running_mean=0, running_var=1)
    ones16, zeros16 = jnp.ones((NHID,), jnp.float32), jnp.zeros((NHID,), jnp.float32)
    bn1_s, bn1_b = _bn_fold(ones16, zeros16, zeros16, ones16)
    tcn_bn_s, tcn_bn_b = _bn_fold(ones16, zeros16, zeros16, ones16)

    # --------------------- fused graph-kernel operands ----------------------------
    w_gc = jnp.kron(adj.T, gc_w)                      # (24,192): x @ w_gc == adj @ (x @ W)
    w_res = jnp.kron(eye12, gc_res)                   # (24,192): per-node residual Linear
    w_gat = jnp.kron(eye12, GAT_ALPHA * gat_w + (1.0 - GAT_ALPHA) * eye16)   # (192,192)

    # TCN Conv1d(16,16,k=3,pad=1) over the node axis as a banded (192,192) matrix,
    # with the eval BN scale folded into the columns.
    w_tap = jnp.transpose(tcn_w, (2, 1, 0))           # (k, in, out)
    band = jnp.zeros((GDIM, GDIM), jnp.float32)
    for k in range(3):
        shift_mat = jnp.eye(N_NODES, k=1 - k, dtype=jnp.float32)   # node n' = n + (k-1)
        band = band + jnp.kron(shift_mat, w_tap[k])
    band = band * jnp.tile(tcn_bn_s, N_NODES)[None, :]

    vecs = jnp.stack([
        jnp.tile(gc_b, N_NODES),                             # GC bias
        jnp.tile(bn1_s, N_NODES),                            # bn1 scale
        jnp.tile(bn1_b, N_NODES),                            # bn1 shift
        jnp.tile(tcn_b * tcn_bn_s + tcn_bn_b, N_NODES),      # TCN bias (+BN shift)
    ])                                                        # (4, 192)

    params = {
        'w_small': jnp.stack([w_gc, w_res]),                 # (2, 24, 192)
        'w_big': jnp.stack([w_gat, band]),                   # (2, 192, 192)
        'vecs': vecs,
    }

    # --------------------- fused temporal-head operands ---------------------------
    ones64, zeros64 = jnp.ones((HID,), jnp.float32), jnp.zeros((HID,), jnp.float32)

    w0 = _kaiming_conv(ks[6], HID, GDIM, 1)[:, :, 0].T       # (192, 64)
    s0, b0 = _bn_fold(ones64, zeros64, zeros64, ones64)
    w0 = w0 * s0[None, :]

    w123, biases = [], [b0]
    for kk in (ks[7], ks[8], ks[9]):
        w = _kaiming_conv(kk, HID, HID, 3)                   # (64, 64, 3)
        s, bsh = _bn_fold(ones64, zeros64, zeros64, ones64)
        wst = jnp.concatenate([w[:, :, 0].T, w[:, :, 1].T, w[:, :, 2].T], axis=0)  # (192,64)
        w123.append(wst * s[None, :])
        biases.append(bsh)

    wc = _kaiming_conv(ks[10], N_CLS, HID, 3)
    wc = jnp.concatenate([wc[:, :, 0].T, wc[:, :, 1].T, wc[:, :, 2].T], axis=0)    # (192,10)

    params.update({
        'w0': w0,                            # (192, 64)  BN folded
        'w123': jnp.stack(w123),             # (3, 192, 64) BN folded
        'wc': wc,                            # (192, 10)
        'bias': jnp.stack(biases),           # (4, 64)
    })
    return params


# ================================ main ===================================
if __name__ == "__main__":
    b, t = 2, 8
    key = jax.random.PRNGKey(0)
    pkey, xkey = jax.random.split(key)
    params = init_params(pkey)
    x = jax.random.normal(xkey, (b, t, N_NODES, NFEAT), dtype=jnp.float32)

    out = jax.jit(forward)(x, params)
    out = jax.block_until_ready(out)
    assert out.shape == (b, N_CLS, t), out.shape
    assert bool(jnp.all(jnp.isfinite(out)))
    print("KERNEL_OK")
</pallas_src>

<mosaic_0001>
module attributes {stable_mosaic.version = 11 : i64} {
  func.func @graph_kernel(%arg0: i32, %arg1: memref<16x24xf32, #tpu.memory_space<vmem>>, %arg2: memref<2x24x192xf32, #tpu.memory_space<vmem>>, %arg3: memref<2x192x192xf32, #tpu.memory_space<vmem>>, %arg4: memref<4x192xf32, #tpu.memory_space<vmem>>, %arg5: memref<16x192xf32, #tpu.memory_space<vmem>>) attributes {dimension_semantics = [#tpu.dimension_semantics<parallel>], iteration_bounds = array<i64: 1>, scalar_prefetch = 0 : i64, scratch_operands = 0 : i64, tpu.core_type = #tpu.core_type<tc>, window_params = [{transform_indices = @transform_0, window_bounds = array<i64: 16, 24>}, {pipeline_mode = #tpu.pipeline_mode<synchronous>, transform_indices = @transform_1, window_bounds = array<i64: 2, 24, 192>}, {pipeline_mode = #tpu.pipeline_mode<synchronous>, transform_indices = @transform_2, window_bounds = array<i64: 2, 192, 192>}, {pipeline_mode = #tpu.pipeline_mode<synchronous>, transform_indices = @transform_3, window_bounds = array<i64: 4, 192>}, {transform_indices = @transform_4, window_bounds = array<i64: 16, 192>}]} {
    %c0 = arith.constant 0 : index
    %c0_0 = arith.constant 0 : index
    %0 = vector.load %arg1[%c0, %c0_0] : memref<16x24xf32, #tpu.memory_space<vmem>>, vector<16x24xf32>
    %c0_1 = arith.constant 0 : index
    %c0_2 = arith.constant 0 : index
    %1 = vector.load %arg4[%c0_1, %c0_2] : memref<4x192xf32, #tpu.memory_space<vmem>>, vector<4x192xf32>
    %2 = vector.extract_strided_slice %1 {offsets = [0, 0], sizes = [1, 192], strides = [1, 1]} : vector<4x192xf32> to vector<1x192xf32>
    %3 = vector.extract_strided_slice %1 {offsets = [1, 0], sizes = [1, 192], strides = [1, 1]} : vector<4x192xf32> to vector<1x192xf32>
    %4 = vector.extract_strided_slice %1 {offsets = [2, 0], sizes = [1, 192], strides = [1, 1]} : vector<4x192xf32> to vector<1x192xf32>
    %5 = vector.extract_strided_slice %1 {offsets = [3, 0], sizes = [1, 192], strides = [1, 1]} : vector<4x192xf32> to vector<1x192xf32>
    %c0_3 = arith.constant 0 : index
    %c0_4 = arith.constant 0 : index
    %c0_5 = arith.constant 0 : index
    %6 = vector.load %arg2[%c0_3, %c0_4, %c0_5] : memref<2x24x192xf32, #tpu.memory_space<vmem>>, vector<1x24x192xf32>
    %7 = vector.shape_cast %6 : vector<1x24x192xf32> to vector<24x192xf32>
    %cst = arith.constant dense<0.000000e+00> : vector<16x192xf32>
    %8 = tpu.matmul %0, %7, %cst {dimension_numbers = #tpu.dot_dimension_numbers<[1], [0], [0], [1], [0, 0, 1, 1], [], []>} : vector<16x24xf32>, vector<24x192xf32>, vector<16x192xf32> -> vector<16x192xf32>
    %9 = vector.broadcast %2 : vector<1x192xf32> to vector<16x192xf32>
    %10 = arith.addf %8, %9 : vector<16x192xf32>
    %c1 = arith.constant 1 : index
    %c0_6 = arith.constant 0 : index
    %c0_7 = arith.constant 0 : index
    %11 = vector.load %arg2[%c1, %c0_6, %c0_7] : memref<2x24x192xf32, #tpu.memory_space<vmem>>, vector<1x24x192xf32>
    %12 = vector.shape_cast %11 : vector<1x24x192xf32> to vector<24x192xf32>
    %cst_8 = arith.constant dense<0.000000e+00> : vector<16x192xf32>
    %13 = tpu.matmul %0, %12, %cst_8 {dimension_numbers = #tpu.dot_dimension_numbers<[1], [0], [0], [1], [0, 0, 1, 1], [], []>} : vector<16x24xf32>, vector<24x192xf32>, vector<16x192xf32> -> vector<16x192xf32>
    %cst_9 = arith.constant 0.000000e+00 : f32
    %14 = vector.broadcast %cst_9 : f32 to vector<16x192xf32>
    %15 = arith.maximumf %10, %14 : vector<16x192xf32>
    %cst_10 = arith.constant 5.000000e-01 : f32
    %16 = vector.broadcast %cst_10 : f32 to vector<16x192xf32>
    %17 = arith.mulf %16, %15 : vector<16x192xf32>
    %cst_11 = arith.constant 5.000000e-01 : f32
    %18 = vector.broadcast %cst_11 : f32 to vector<16x192xf32>
    %19 = arith.mulf %18, %13 : vector<16x192xf32>
    %20 = arith.addf %17, %19 : vector<16x192xf32>
    %21 = vector.broadcast %3 : vector<1x192xf32> to vector<16x192xf32>
    %22 = arith.mulf %20, %21 : vector<16x192xf32>
    %23 = vector.broadcast %4 : vector<1x192xf32> to vector<16x192xf32>
    %24 = arith.addf %22, %23 : vector<16x192xf32>
    %cst_12 = arith.constant 0.000000e+00 : f32
    %25 = vector.broadcast %cst_12 : f32 to vector<16x192xf32>
    %26 = arith.maximumf %24, %25 : vector<16x192xf32>
    %c0_13 = arith.constant 0 : index
    %c0_14 = arith.constant 0 : index
    %c0_15 = arith.constant 0 : index
    %27 = vector.load %arg3[%c0_13, %c0_14, %c0_15] : memref<2x192x192xf32, #tpu.memory_space<vmem>>, vector<1x192x192xf32>
    %28 = vector.shape_cast %27 : vector<1x192x192xf32> to vector<192x192xf32>
    %cst_16 = arith.constant dense<0.000000e+00> : vector<16x192xf32>
    %29 = tpu.matmul %26, %28, %cst_16 {dimension_numbers = #tpu.dot_dimension_numbers<[1], [0], [0], [1], [0, 0, 1, 1], [], []>} : vector<16x192xf32>, vector<192x192xf32>, vector<16x192xf32> -> vector<16x192xf32>
    %c1_17 = arith.constant 1 : index
    %c0_18 = arith.constant 0 : index
    %c0_19 = arith.constant 0 : index
    %30 = vector.load %arg3[%c1_17, %c0_18, %c0_19] : memref<2x192x192xf32, #tpu.memory_space<vmem>>, vector<1x192x192xf32>
    %31 = vector.shape_cast %30 : vector<1x192x192xf32> to vector<192x192xf32>
    %cst_20 = arith.constant dense<0.000000e+00> : vector<16x192xf32>
    %32 = tpu.matmul %29, %31, %cst_20 {dimension_numbers = #tpu.dot_dimension_numbers<[1], [0], [0], [1], [0, 0, 1, 1], [], []>} : vector<16x192xf32>, vector<192x192xf32>, vector<16x192xf32> -> vector<16x192xf32>
    %33 = vector.broadcast %5 : vector<1x192xf32> to vector<16x192xf32>
    %34 = arith.addf %32, %33 : vector<16x192xf32>
    %cst_21 = arith.constant 0.000000e+00 : f32
    %35 = vector.broadcast %cst_21 : f32 to vector<16x192xf32>
    %36 = arith.maximumf %34, %35 : vector<16x192xf32>
    %cst_22 = arith.constant 5.000000e-01 : f32
    %37 = vector.broadcast %cst_22 : f32 to vector<16x192xf32>
    %38 = arith.mulf %37, %36 : vector<16x192xf32>
    %cst_23 = arith.constant 5.000000e-01 : f32
    %39 = vector.broadcast %cst_23 : f32 to vector<16x192xf32>
    %40 = arith.mulf %39, %29 : vector<16x192xf32>
    %41 = arith.addf %38, %40 : vector<16x192xf32>
    %c0_24 = arith.constant 0 : index
    %c0_25 = arith.constant 0 : index
    %42 = vector.load %arg5[%c0_24, %c0_25] : memref<16x192xf32, #tpu.memory_space<vmem>>, vector<16x192xf32>
    tpu.vector_store %arg5[%c0_24, %c0_25], %41 {strides = array<i32>} : memref<16x192xf32, #tpu.memory_space<vmem>>, vector<16x192xf32>,
    return
  }
  func.func @transform_0(%arg0: i32) -> (i32, i32) {
    %c0_i32 = arith.constant 0 : i32
    %c0_i32_0 = arith.constant 0 : i32
    return %arg0, %c0_i32 : i32, i32
  }
  func.func @transform_1(%arg0: i32) -> (i32, i32, i32) {
    %c0_i32 = arith.constant 0 : i32
    %c0_i32_0 = arith.constant 0 : i32
    %c0_i32_1 = arith.constant 0 : i32
    %c0_i32_2 = arith.constant 0 : i32
    return %c0_i32, %c0_i32_0, %c0_i32_1 : i32, i32, i32
  }
  func.func @transform_2(%arg0: i32) -> (i32, i32, i32) {
    %c0_i32 = arith.constant 0 : i32
    %c0_i32_0 = arith.constant 0 : i32
    %c0_i32_1 = arith.constant 0 : i32
    %c0_i32_2 = arith.constant 0 : i32
    return %c0_i32, %c0_i32_0, %c0_i32_1 : i32, i32, i32
  }
  func.func @transform_3(%arg0: i32) -> (i32, i32) {
    %c0_i32 = arith.constant 0 : i32
    %c0_i32_0 = arith.constant 0 : i32
    %c0_i32_1 = arith.constant 0 : i32
    return %c0_i32, %c0_i32_0 : i32, i32
  }
  func.func @transform_4(%arg0: i32) -> (i32, i32) {
    %c0_i32 = arith.constant 0 : i32
    %c0_i32_0 = arith.constant 0 : i32
    return %arg0, %c0_i32 : i32, i32
  }
}

module attributes {stable_mosaic.version = 11 : i64} {
  func.func @temporal_kernel(%arg0: i32, %arg1: memref<1x8x192xf32, #tpu.memory_space<vmem>>, %arg2: memref<192x64xf32, #tpu.memory_space<vmem>>, %arg3: memref<3x192x64xf32, #tpu.memory_space<vmem>>, %arg4: memref<192x10xf32, #tpu.memory_space<vmem>>, %arg5: memref<4x64xf32, #tpu.memory_space<vmem>>, %arg6: memref<1x8x10xf32, #tpu.memory_space<vmem>>) attributes {dimension_semantics = [#tpu.dimension_semantics<parallel>], iteration_bounds = array<i64: 2>, scalar_prefetch = 0 : i64, scratch_operands = 0 : i64, tpu.core_type = #tpu.core_type<tc>, window_params = [{transform_indices = @transform_0, window_bounds = array<i64: 1, 8, 192>}, {pipeline_mode = #tpu.pipeline_mode<synchronous>, transform_indices = @transform_1, window_bounds = array<i64: 192, 64>}, {pipeline_mode = #tpu.pipeline_mode<synchronous>, transform_indices = @transform_2, window_bounds = array<i64: 3, 192, 64>}, {pipeline_mode = #tpu.pipeline_mode<synchronous>, transform_indices = @transform_3, window_bounds = array<i64: 192, 10>}, {pipeline_mode = #tpu.pipeline_mode<synchronous>, transform_indices = @transform_4, window_bounds = array<i64: 4, 64>}, {transform_indices = @transform_5, window_bounds = array<i64: 1, 8, 10>}]} {
    %c0 = arith.constant 0 : index
    %c0_0 = arith.constant 0 : index
    %c0_1 = arith.constant 0 : index
    %0 = vector.load %arg1[%c0, %c0_0, %c0_1] : memref<1x8x192xf32, #tpu.memory_space<vmem>>, vector<1x8x192xf32>
    %1 = vector.shape_cast %0 : vector<1x8x192xf32> to vector<8x192xf32>
    %c0_2 = arith.constant 0 : index
    %c0_3 = arith.constant 0 : index
    %2 = vector.load %arg5[%c0_2, %c0_3] : memref<4x64xf32, #tpu.memory_space<vmem>>, vector<4x64xf32>
    %c0_4 = arith.constant 0 : index
    %c0_5 = arith.constant 0 : index
    %3 = vector.load %arg2[%c0_4, %c0_5] : memref<192x64xf32, #tpu.memory_space<vmem>>, vector<192x64xf32>
    %cst = arith.constant dense<0.000000e+00> : vector<8x64xf32>
    %4 = tpu.matmul %1, %3, %cst {dimension_numbers = #tpu.dot_dimension_numbers<[1], [0], [0], [1], [0, 0, 1, 1], [], []>} : vector<8x192xf32>, vector<192x64xf32>, vector<8x64xf32> -> vector<8x64xf32>
    %5 = vector.extract_strided_slice %2 {offsets = [0, 0], sizes = [1, 64], strides = [1, 1]} : vector<4x64xf32> to vector<1x64xf32>
    %6 = vector.broadcast %5 : vector<1x64xf32> to vector<8x64xf32>
    %7 = arith.addf %4, %6 : vector<8x64xf32>
    %cst_6 = arith.constant 0.000000e+00 : f32
    %8 = vector.broadcast %cst_6 : f32 to vector<8x64xf32>
    %9 = arith.maximumf %7, %8 : vector<8x64xf32>
    %cst_7 = arith.constant 0.000000e+00 : f32
    %10 = vector.broadcast %cst_7 : f32 to vector<1x64xf32>
    %11 = vector.extract_strided_slice %9 {offsets = [0, 0], sizes = [7, 64], strides = [1, 1]} : vector<8x64xf32> to vector<7x64xf32>
    %12 = tpu.concatenate %10, %11 in 0 : vector<1x64xf32>, vector<7x64xf32> -> vector<8x64xf32>
    %13 = vector.extract_strided_slice %9 {offsets = [1, 0], sizes = [7, 64], strides = [1, 1]} : vector<8x64xf32> to vector<7x64xf32>
    %14 = tpu.concatenate %13, %10 in 0 : vector<7x64xf32>, vector<1x64xf32> -> vector<8x64xf32>
    %15 = tpu.concatenate %12, %9, %14 in 1 : vector<8x64xf32>, vector<8x64xf32>, vector<8x64xf32> -> vector<8x192xf32>
    %c0_8 = arith.constant 0 : index
    %c0_9 = arith.constant 0 : index
    %c0_10 = arith.constant 0 : index
    %16 = vector.load %arg3[%c0_8, %c0_9, %c0_10] : memref<3x192x64xf32, #tpu.memory_space<vmem>>, vector<1x192x64xf32>
    %17 = vector.shape_cast %16 : vector<1x192x64xf32> to vector<192x64xf32>
    %cst_11 = arith.constant dense<0.000000e+00> : vector<8x64xf32>
    %18 = tpu.matmul %15, %17, %cst_11 {dimension_numbers = #tpu.dot_dimension_numbers<[1], [0], [0], [1], [0, 0, 1, 1], [], []>} : vector<8x192xf32>, vector<192x64xf32>, vector<8x64xf32> -> vector<8x64xf32>
    %19 = vector.extract_strided_slice %2 {offsets = [1, 0], sizes = [1, 64], strides = [1, 1]} : vector<4x64xf32> to vector<1x64xf32>
    %20 = vector.broadcast %19 : vector<1x64xf32> to vector<8x64xf32>
    %21 = arith.addf %18, %20 : vector<8x64xf32>
    %cst_12 = arith.constant 0.000000e+00 : f32
    %22 = vector.broadcast %cst_12 : f32 to vector<8x64xf32>
    %23 = arith.maximumf %21, %22 : vector<8x64xf32>
    %cst_13 = arith.constant 0.000000e+00 : f32
    %24 = vector.broadcast %cst_13 : f32 to vector<2x64xf32>
    %25 = vector.extract_strided_slice %23 {offsets = [0, 0], sizes = [6, 64], strides = [1, 1]} : vector<8x64xf32> to vector<6x64xf32>
    %26 = tpu.concatenate %24, %25 in 0 : vector<2x64xf32>, vector<6x64xf32> -> vector<8x64xf32>
    %27 = vector.extract_strided_slice %23 {offsets = [2, 0], sizes = [6, 64], strides = [1, 1]} : vector<8x64xf32> to vector<6x64xf32>
    %28 = tpu.concatenate %27, %24 in 0 : vector<6x64xf32>, vector<2x64xf32> -> vector<8x64xf32>
    %29 = tpu.concatenate %26, %23, %28 in 1 : vector<8x64xf32>, vector<8x64xf32>, vector<8x64xf32> -> vector<8x192xf32>
    %c1 = arith.constant 1 : index
    %c0_14 = arith.constant 0 : index
    %c0_15 = arith.constant 0 : index
    %30 = vector.load %arg3[%c1, %c0_14, %c0_15] : memref<3x192x64xf32, #tpu.memory_space<vmem>>, vector<1x192x64xf32>
    %31 = vector.shape_cast %30 : vector<1x192x64xf32> to vector<192x64xf32>
    %cst_16 = arith.constant dense<0.000000e+00> : vector<8x64xf32>
    %32 = tpu.matmul %29, %31, %cst_16 {dimension_numbers = #tpu.dot_dimension_numbers<[1], [0], [0], [1], [0, 0, 1, 1], [], []>} : vector<8x192xf32>, vector<192x64xf32>, vector<8x64xf32> -> vector<8x64xf32>
    %33 = vector.extract_strided_slice %2 {offsets = [2, 0], sizes = [1, 64], strides = [1, 1]} : vector<4x64xf32> to vector<1x64xf32>
    %34 = vector.broadcast %33 : vector<1x64xf32> to vector<8x64xf32>
    %35 = arith.addf %32, %34 : vector<8x64xf32>
    %cst_17 = arith.constant 0.000000e+00 : f32
    %36 = vector.broadcast %cst_17 : f32 to vector<8x64xf32>
    %37 = arith.maximumf %35, %36 : vector<8x64xf32>
    %cst_18 = arith.constant 0.000000e+00 : f32
    %38 = vector.broadcast %cst_18 : f32 to vector<2x64xf32>
    %39 = vector.extract_strided_slice %37 {offsets = [0, 0], sizes = [6, 64], strides = [1, 1]} : vector<8x64xf32> to vector<6x64xf32>
    %40 = tpu.concatenate %38, %39 in 0 : vector<2x64xf32>, vector<6x64xf32> -> vector<8x64xf32>
    %41 = vector.extract_strided_slice %37 {offsets = [2, 0], sizes = [6, 64], strides = [1, 1]} : vector<8x64xf32> to vector<6x64xf32>
    %42 = tpu.concatenate %41, %38 in 0 : vector<6x64xf32>, vector<2x64xf32> -> vector<8x64xf32>
    %43 = tpu.concatenate %40, %37, %42 in 1 : vector<8x64xf32>, vector<8x64xf32>, vector<8x64xf32> -> vector<8x192xf32>
    %c2 = arith.constant 2 : index
    %c0_19 = arith.constant 0 : index
    %c0_20 = arith.constant 0 : index
    %44 = vector.load %arg3[%c2, %c0_19, %c0_20] : memref<3x192x64xf32, #tpu.memory_space<vmem>>, vector<1x192x64xf32>
    %45 = vector.shape_cast %44 : vector<1x192x64xf32> to vector<192x64xf32>
    %cst_21 = arith.constant dense<0.000000e+00> : vector<8x64xf32>
    %46 = tpu.matmul %43, %45, %cst_21 {dimension_numbers = #tpu.dot_dimension_numbers<[1], [0], [0], [1], [0, 0, 1, 1], [], []>} : vector<8x192xf32>, vector<192x64xf32>, vector<8x64xf32> -> vector<8x64xf32>
    %47 = vector.extract_strided_slice %2 {offsets = [3, 0], sizes = [1, 64], strides = [1, 1]} : vector<4x64xf32> to vector<1x64xf32>
    %48 = vector.broadcast %47 : vector<1x64xf32> to vector<8x64xf32>
    %49 = arith.addf %46, %48 : vector<8x64xf32>
    %cst_22 = arith.constant 0.000000e+00 : f32
    %50 = vector.broadcast %cst_22 : f32 to vector<8x64xf32>
    %51 = arith.maximumf %49, %50 : vector<8x64xf32>
    %cst_23 = arith.constant 0.000000e+00 : f32
    %52 = vector.broadcast %cst_23 : f32 to vector<2x64xf32>
    %53 = vector.extract_strided_slice %51 {offsets = [0, 0], sizes = [6, 64], strides = [1, 1]} : vector<8x64xf32> to vector<6x64xf32>
    %54 = tpu.concatenate %52, %53 in 0 : vector<2x64xf32>, vector<6x64xf32> -> vector<8x64xf32>
    %55 = vector.extract_strided_slice %51 {offsets = [2, 0], sizes = [6, 64], strides = [1, 1]} : vector<8x64xf32> to vector<6x64xf32>
    %56 = tpu.concatenate %55, %52 in 0 : vector<6x64xf32>, vector<2x64xf32> -> vector<8x64xf32>
    %57 = tpu.concatenate %54, %51, %56 in 1 : vector<8x64xf32>, vector<8x64xf32>, vector<8x64xf32> -> vector<8x192xf32>
    %c0_24 = arith.constant 0 : index
    %c0_25 = arith.constant 0 : index
    %58 = vector.load %arg4[%c0_24, %c0_25] : memref<192x10xf32, #tpu.memory_space<vmem>>, vector<192x10xf32>
    %cst_26 = arith.constant dense<0.000000e+00> : vector<8x10xf32>
    %59 = tpu.matmul %57, %58, %cst_26 {dimension_numbers = #tpu.dot_dimension_numbers<[1], [0], [0], [1], [0, 0, 1, 1], [], []>} : vector<8x192xf32>, vector<192x10xf32>, vector<8x10xf32> -> vector<8x10xf32>
    %c0_27 = arith.constant 0 : index
    %c0_28 = arith.constant 0 : index
    %c0_29 = arith.constant 0 : index
    %60 = vector.load %arg6[%c0_27, %c0_28, %c0_29] : memref<1x8x10xf32, #tpu.memory_space<vmem>>, vector<1x8x10xf32>
    %61 = vector.shape_cast %60 : vector<1x8x10xf32> to vector<8x10xf32>
    %62 = vector.shape_cast %59 : vector<8x10xf32> to vector<1x8x10xf32>
    tpu.vector_store %arg6[%c0_27, %c0_28, %c0_29], %62 {strides = array<i32>} : memref<1x8x10xf32, #tpu.memory_space<vmem>>, vector<1x8x10xf32>,
    return
  }
  func.func @transform_0(%arg0: i32) -> (i32, i32, i32) {
    %c0_i32 = arith.constant 0 : i32
    %c0_i32_0 = arith.constant 0 : i32
    %c0_i32_1 = arith.constant 0 : i32
    return %arg0, %c0_i32, %c0_i32_0 : i32, i32, i32
  }
  func.func @transform_1(%arg0: i32) -> (i32, i32) {
    %c0_i32 = arith.constant 0 : i32
    %c0_i32_0 = arith.constant 0 : i32
    %c0_i32_1 = arith.constant 0 : i32
    return %c0_i32, %c0_i32_0 : i32, i32
  }
  func.func @transform_2(%arg0: i32) -> (i32, i32, i32) {
    %c0_i32 = arith.constant 0 : i32
    %c0_i32_0 = arith.constant 0 : i32
    %c0_i32_1 = arith.constant 0 : i32
    %c0_i32_2 = arith.constant 0 : i32
    return %c0_i32, %c0_i32_0, %c0_i32_1 : i32, i32, i32
  }
  func.func @transform_3(%arg0: i32) -> (i32, i32) {
    %c0_i32 = arith.constant 0 : i32
    %c0_i32_0 = arith.constant 0 : i32
    %c0_i32_1 = arith.constant 0 : i32
    return %c0_i32, %c0_i32_0 : i32, i32
  }
  func.func @transform_4(%arg0: i32) -> (i32, i32) {
    %c0_i32 = arith.constant 0 : i32
    %c0_i32_0 = arith.constant 0 : i32
    %c0_i32_1 = arith.constant 0 : i32
    return %c0_i32, %c0_i32_0 : i32, i32
  }
  func.func @transform_5(%arg0: i32) -> (i32, i32, i32) {
    %c0_i32 = arith.constant 0 : i32
    %c0_i32_0 = arith.constant 0 : i32
    %c0_i32_1 = arith.constant 0 : i32
    return %arg0, %c0_i32, %c0_i32_0 : i32, i32, i32
  }
}

</mosaic_0001>

<bundles_post_ra>
// kernel: forward.2
= control target key start
LH: loop header
LB: loop body
LE: loop exit
PB: predicated region body
PF: predicated region fallthrough
CT: control target
= control target key end

     0   :  { %9 = vsyncpa [#allocation3], 0  ;;  %s638_s15 = smov [#allocation2]   ;;  %s757_s0 = inlined_call_operand.vmem [shape: f32[16,24], index: 0, kind: input, shape index: {}]   ;;  %s758_s1 = inlined_call_operand.vmem [shape: f32[2,24,192], index: 1, kind: input, shape index: {}]   ;;  %s759_s2 = inlined_call_operand.hbm [shape: f32[2,192,192], index: 2, kind: input, shape index: {}]   ;;  %s760_s3 = inlined_call_operand.vmem [shape: f32[4,192], index: 3, kind: input, shape index: {}]   ;;  %s761_s4 = inlined_call_operand.vmem [shape: f32[16,192], index: 4, kind: output, shape index: {}]  }
   0x1   :  { %s19_s16 = sshll.u32 %s638_s15, 4  ;;  %s20_s16 = int_to_ptr.vmem [resolvable:$true] %s19_s16 }
   0x2   :  { %s624_s17 = scalar_lea.vmem %s20_s16, 12288  ;;  %p629_p1 = scmp.lt.s32.totalorder %s20_s16, %s20_s16 }
   0x3   :  { %p625_p0 = scmp.ne.s32.totalorder %s20_s16, %s624_s17  ;;  %p630_p2 = scmp.lt.s32.totalorder %s624_s17, %s624_s17 }
   0x5   :  { %p631_p3 = por %p630_p2, %p629_p1 }
   0x7   :  { %p632_p4 = pnand %p631_p3, %p625_p0 }
   0x9   :  { %635 = shalt.err (!%p632_p4)
}
   0xa   :  { %s639_s18 = smov 256   ;;  %s640_s19 = smov 16  }
   0xb   :  { %25 = dma.hbm_to_vmem [thread:$0]  %s759_s2, 12288, %s20_s16, [#allocation3], %s639_s18, %s639_s18, %s640_s19  }
   0xc   :  { %636 = dma.done.wait [#allocation3], 12288  }
   0xd   :  { %637 = vsyncadd [#allocation3], 4294955008  ;;  %v641_v0 = vmov 0.0   ;;  %v39_v1 = vld [vmem:[%s758_s1 + $0x28] sm:$0xff]  ;;  %v38_v2 = vld [vmem:[%s758_s1 + $0x20] sm:$0xff]  ;;  %vm59_vm0 = vcmask 195584  }
   0xe   :  { %130 = vmatprep.mubr.f32.mxu0 %v641_v0  ;;  %214 = vmatprep.mubr.f32.mxu1 %v641_v0  ;;  %v37_v3 = vld [vmem:[%s758_s1 + $0x18] sm:$0xff]  ;;  %v36_v5 = vld [vmem:[%s758_s1 + $0x10] sm:$0xff]  ;;  %v35_v7 = vld [vmem:[%s758_s1 + $0x8] sm:$0xff]  ;;  %vm339_vm1 = vcmask 523264  }
   0xf   :  { %92 = vmatprep.subr.mxu0 %v39_v1  ;;  %v605_v4 = vld [vmem:[%s758_s1 + $0x58] sm:$0xff]  ;;  %v604_v6 = vld [vmem:[%s758_s1 + $0x50] sm:$0xff]  ;;  %v603_v8 = vld [vmem:[%s758_s1 + $0x48] sm:$0xff] }
  0x10   :  { %93 = vmatpush1.msra.mxu0 %v38_v2  ;;  %176 = vmatprep.subr.mxu1 %v605_v4  ;;  %v34_v9 = vld [vmem:[%s758_s1] sm:$0xff]  ;;  %v601_v11 = vld [vmem:[%s758_s1 + $0x38] sm:$0xff]  ;;  %v600_v13 = vld [vmem:[%s758_s1 + $0x30] sm:$0xff] }
  0x11   :  { %94 = vmatprep.subr.mxu0 %v37_v3  ;;  %177 = vmatpush1.msra.mxu1 %v604_v6  ;;  %v602_v10 = vld [vmem:[%s758_s1 + $0x40] sm:$0xff]  ;;  %v322_v14 = vld [vmem:[#allocation2 + $0xf8] sm:$0xff]  ;;  %v321_v15 = vld [vmem:[#allocation2 + $0xf0] sm:$0xff] }
  0x12   :  { %95 = vmatpush1.msra.mxu0 %v36_v5  ;;  %178 = vmatprep.subr.mxu1 %v603_v8  ;;  %v31_v12 = vld [vmem:[%s757_s0] sm:$0xff]  ;;  %v32_v16 = vld [vmem:[%s757_s0 + $0x8] sm:$0xff]  ;;  %v318_v19 = vld [vmem:[#allocation2 + $0xd8] sm:$0xff] }
  0x13   :  { %96 = vmatprep.subr.mxu0 %v35_v7  ;;  %179 = vmatpush1.msra.mxu1 %v602_v10  ;;  %v320_v17 = vld [vmem:[#allocation2 + $0xe8] sm:$0xff]  ;;  %v319_v18 = vld [vmem:[#allocation2 + $0xe0] sm:$0xff]  ;;  %v317_v20 = vld [vmem:[#allocation2 + $0xd0] sm:$0xff] }
  0x14   :  { %97 = vmatpush1.msra.mxu0 %v34_v9  ;;  %180 = vmatprep.subr.mxu1 %v601_v11  ;;  %v316_v21 = vld [vmem:[#allocation2 + $0xc8] sm:$0xff]  ;;  %v315_v22 = vld [vmem:[#allocation2 + $0xc0] sm:$0xff]  ;;  %v314_v23 = vld [vmem:[#allocation2 + $0xb8] sm:$0xff] }
  0x15   :  { %598 = vmatmul.mubr.msk.f32.vlgmr.msra.gmra.mxu0 %vm59_vm0, %v31_v12  ;;  %181 = vmatpush1.msra.mxu1 %v600_v13  ;;  %v313_v24 = vld [vmem:[#allocation2 + $0xb0] sm:$0xff]  ;;  %v312_v25 = vld [vmem:[#allocation2 + $0xa8] sm:$0xff]  ;;  %v311_v26 = vld [vmem:[#allocation2 + $0xa0] sm:$0xff] }
  0x16   :  { %606 = vmatmul.mubr.msk.f32.vlgmr.msra.gmra.mxu1 %vm59_vm0, %v31_v12  ;;  %136 = vmatprep.mubr.f32.mxu0 %v641_v0  ;;  %v310_v27 = vld [vmem:[#allocation2 + $0x98] sm:$0xff]  ;;  %v309_v28 = vld [vmem:[#allocation2 + $0x90] sm:$0xff]  ;;  %v308_v29 = vld [vmem:[#allocation2 + $0x88] sm:$0xff] }
  0x17   :  { %220 = vmatprep.mubr.f32.mxu1 %v641_v0  ;;  %346 = vmatprep.subr.mxu0 %v322_v14  ;;  %v307_v30 = vld [vmem:[#allocation2 + $0x80] sm:$0xff]  ;;  %v306_v31 = vld [vmem:[#allocation2 + $0x78] sm:$0xff]  ;;  %v305_v32 = vld [vmem:[#allocation2 + $0x70] sm:$0xff] }
  0x18   :  { %347 = vmatpush1.msra.mxu0 %v321_v15  ;;  %v304_v33 = vld [vmem:[#allocation2 + $0x68] sm:$0xff]  ;;  %v303_v34 = vld [vmem:[#allocation2 + $0x60] sm:$0xff]  ;;  %v302_v35 = vld [vmem:[#allocation2 + $0x58] sm:$0xff] }
  0x19   :  { %599 = vmatmul.mubr.msk.f32.gmra.mxu0 %vm59_vm0, %v32_v16  ;;  %348 = vmatprep.subr.mxu0 %v320_v17  ;;  %v301_v36 = vld [vmem:[#allocation2 + $0x50] sm:$0xff]  ;;  %v300_v37 = vld [vmem:[#allocation2 + $0x48] sm:$0xff]  ;;  %v299_v38 = vld [vmem:[#allocation2 + $0x40] sm:$0xff] }
  0x1a   :  { %607 = vmatmul.mubr.msk.f32.gmra.mxu1 %vm59_vm0, %v32_v16  ;;  %349 = vmatpush1.msra.mxu0 %v319_v18  ;;  %v298_v39 = vld [vmem:[#allocation2 + $0x38] sm:$0xff]  ;;  %v297_v40 = vld [vmem:[#allocation2 + $0x30] sm:$0xff]  ;;  %v296_v41 = vld [vmem:[#allocation2 + $0x28] sm:$0xff] }
  0x1b   :  { %350 = vmatprep.subr.mxu0 %v318_v19  ;;  %v295_v42 = vld [vmem:[#allocation2 + $0x20] sm:$0xff]  ;;  %v294_v43 = vld [vmem:[#allocation2 + $0x18] sm:$0xff]  ;;  %v293_v44 = vld [vmem:[#allocation2 + $0x10] sm:$0xff] }
  0x1c   :  { %351 = vmatpush1.msra.mxu0 %v317_v20  ;;  %v292_v45 = vld [vmem:[#allocation2 + $0x8] sm:$0xff]  ;;  %v291_v46 = vld [vmem:[#allocation2] sm:$0xff]  ;;  %v338_v47 = vld [vmem:[#allocation2 + $0x178] sm:$0xff] }
  0x1d   :  { %352 = vmatprep.subr.mxu0 %v316_v21  ;;  %v337_v48 = vld [vmem:[#allocation2 + $0x170] sm:$0xff]  ;;  %v336_v49 = vld [vmem:[#allocation2 + $0x168] sm:$0xff]  ;;  %v335_v50 = vld [vmem:[#allocation2 + $0x160] sm:$0xff] }
  0x1e   :  { %353 = vmatpush1.msra.mxu0 %v315_v22  ;;  %v334_v51 = vld [vmem:[#allocation2 + $0x158] sm:$0xff]  ;;  %v333_v52 = vld [vmem:[#allocation2 + $0x150] sm:$0xff]  ;;  %v332_v53 = vld [vmem:[#allocation2 + $0x148] sm:$0xff] }
  0x1f   :  { %354 = vmatprep.subr.mxu0 %v314_v23  ;;  %v331_v54 = vld [vmem:[#allocation2 + $0x140] sm:$0xff]  ;;  %v330_v55 = vld [vmem:[#allocation2 + $0x138] sm:$0xff]  ;;  %v329_v56 = vld [vmem:[#allocation2 + $0x130] sm:$0xff] }
  0x20   :  { %355 = vmatpush1.msra.mxu0 %v313_v24  ;;  %v328_v57 = vld [vmem:[#allocation2 + $0x128] sm:$0xff]  ;;  %v327_v58 = vld [vmem:[#allocation2 + $0x120] sm:$0xff]  ;;  %v326_v59 = vld [vmem:[#allocation2 + $0x118] sm:$0xff] }
  0x21   :  { %356 = vmatprep.subr.mxu0 %v312_v25  ;;  %v325_v60 = vld [vmem:[#allocation2 + $0x110] sm:$0xff]  ;;  %v324_v61 = vld [vmem:[#allocation2 + $0x108] sm:$0xff]  ;;  %v323_v62 = vld [vmem:[#allocation2 + $0x100] sm:$0xff] }
  0x22   :  { %357 = vmatpush1.msra.mxu0 %v311_v26  ;;  %v455_v63 = vld [vmem:[#allocation2 + $0x278] sm:$0xff]  ;;  %v454_v0 = vld [vmem:[#allocation2 + $0x270] sm:$0xff]  ;;  %v453_v1 = vld [vmem:[#allocation2 + $0x268] sm:$0xff] }
  0x23   :  { %358 = vmatprep.subr.mxu0 %v310_v27  ;;  %496 = vmatprep.subr.mxu1 %v455_v63  ;;  %v452_v2 = vld [vmem:[#allocation2 + $0x260] sm:$0xff]  ;;  %v451_v3 = vld [vmem:[#allocation2 + $0x258] sm:$0xff]  ;;  %v450_v4 = vld [vmem:[#allocation2 + $0x250] sm:$0xff] }
  0x24   :  { %359 = vmatpush1.msra.mxu0 %v309_v28  ;;  %497 = vmatpush1.msra.mxu1 %v454_v0  ;;  %v449_v5 = vld [vmem:[#allocation2 + $0x248] sm:$0xff]  ;;  %v448_v6 = vld [vmem:[#allocation2 + $0x240] sm:$0xff]  ;;  %v447_v7 = vld [vmem:[#allocation2 + $0x238] sm:$0xff] }
  0x25   :  { %360 = vmatprep.subr.mxu0 %v308_v29  ;;  %498 = vmatprep.subr.mxu1 %v453_v1  ;;  %v446_v8 = vld [vmem:[#allocation2 + $0x230] sm:$0xff]  ;;  %v445_v9 = vld [vmem:[#allocation2 + $0x228] sm:$0xff]  ;;  %v444_v10 = vld [vmem:[#allocation2 + $0x220] sm:$0xff] }
  0x26   :  { %361 = vmatpush1.msra.mxu0 %v307_v30  ;;  %499 = vmatpush1.msra.mxu1 %v452_v2  ;;  %v443_v11 = vld [vmem:[#allocation2 + $0x218] sm:$0xff]  ;;  %v442_v12 = vld [vmem:[#allocation2 + $0x210] sm:$0xff]  ;;  %v441_v13 = vld [vmem:[#allocation2 + $0x208] sm:$0xff] }
  0x27   :  { %362 = vmatprep.subr.mxu0 %v306_v31  ;;  %500 = vmatprep.subr.mxu1 %v451_v3  ;;  %v440_v14 = vld [vmem:[#allocation2 + $0x200] sm:$0xff]  ;;  %v439_v15 = vld [vmem:[#allocation2 + $0x1f8] sm:$0xff]  ;;  %v438_v16 = vld [vmem:[#allocation2 + $0x1f0] sm:$0xff] }
  0x28   :  { %363 = vmatpush1.msra.mxu0 %v305_v32  ;;  %501 = vmatpush1.msra.mxu1 %v450_v4  ;;  %v437_v17 = vld [vmem:[#allocation2 + $0x1e8] sm:$0xff]  ;;  %v436_v18 = vld [vmem:[#allocation2 + $0x1e0] sm:$0xff]  ;;  %v435_v19 = vld [vmem:[#allocation2 + $0x1d8] sm:$0xff] }
  0x29   :  { %364 = vmatprep.subr.mxu0 %v304_v33  ;;  %502 = vmatprep.subr.mxu1 %v449_v5  ;;  %v434_v20 = vld [vmem:[#allocation2 + $0x1d0] sm:$0xff]  ;;  %v433_v21 = vld [vmem:[#allocation2 + $0x1c8] sm:$0xff]  ;;  %v432_v22 = vld [vmem:[#allocation2 + $0x1c0] sm:$0xff] }
  0x2a   :  { %365 = vmatpush1.msra.mxu0 %v303_v34  ;;  %503 = vmatpush1.msra.mxu1 %v448_v6  ;;  %v431_v23 = vld [vmem:[#allocation2 + $0x1b8] sm:$0xff]  ;;  %v430_v24 = vld [vmem:[#allocation2 + $0x1b0] sm:$0xff]  ;;  %v429_v25 = vld [vmem:[#allocation2 + $0x1a8] sm:$0xff] }
  0x2b   :  { %366 = vmatprep.subr.mxu0 %v302_v35  ;;  %504 = vmatprep.subr.mxu1 %v447_v7  ;;  %v428_v26 = vld [vmem:[#allocation2 + $0x1a0] sm:$0xff]  ;;  %v427_v27 = vld [vmem:[#allocation2 + $0x198] sm:$0xff]  ;;  %v426_v28 = vld [vmem:[#allocation2 + $0x190] sm:$0xff] }
  0x2c   :  { %367 = vmatpush1.msra.mxu0 %v301_v36  ;;  %505 = vmatpush1.msra.mxu1 %v446_v8  ;;  %v425_v29 = vld [vmem:[#allocation2 + $0x188] sm:$0xff]  ;;  %v424_v30 = vld [vmem:[#allocation2 + $0x180] sm:$0xff]  ;;  %v471_v31 = vld [vmem:[#allocation2 + $0x2f8] sm:$0xff] }
  0x2d   :  { %368 = vmatprep.subr.mxu0 %v300_v37  ;;  %506 = vmatprep.subr.mxu1 %v445_v9  ;;  %v470_v32 = vld [vmem:[#allocation2 + $0x2f0] sm:$0xff]  ;;  %v469_v33 = vld [vmem:[#allocation2 + $0x2e8] sm:$0xff]  ;;  %v468_v34 = vld [vmem:[#allocation2 + $0x2e0] sm:$0xff] }
  0x2e   :  { %369 = vmatpush1.msra.mxu0 %v299_v38  ;;  %507 = vmatpush1.msra.mxu1 %v444_v10  ;;  %v467_v35 = vld [vmem:[#allocation2 + $0x2d8] sm:$0xff]  ;;  %v466_v36 = vld [vmem:[#allocation2 + $0x2d0] sm:$0xff]  ;;  %v465_v37 = vld [vmem:[#allocation2 + $0x2c8] sm:$0xff] }
  0x2f   :  { %370 = vmatprep.subr.mxu0 %v298_v39  ;;  %508 = vmatprep.subr.mxu1 %v443_v11  ;;  %v464_v38 = vld [vmem:[#allocation2 + $0x2c0] sm:$0xff]  ;;  %v463_v39 = vld [vmem:[#allocation2 + $0x2b8] sm:$0xff] }
  0x30   :  { %371 = vmatpush1.msra.mxu0 %v297_v40  ;;  %509 = vmatpush1.msra.mxu1 %v442_v12  ;;  %v462_v40 = vld [vmem:[#allocation2 + $0x2b0] sm:$0xff] }
  0x31   :  { %372 = vmatprep.subr.mxu0 %v296_v41  ;;  %510 = vmatprep.subr.mxu1 %v441_v13  ;;  %v461_v41 = vld [vmem:[#allocation2 + $0x2a8] sm:$0xff] }
  0x32   :  { %373 = vmatpush1.msra.mxu0 %v295_v42  ;;  %511 = vmatpush1.msra.mxu1 %v440_v14  ;;  %v460_v42 = vld [vmem:[#allocation2 + $0x2a0] sm:$0xff] }
  0x33   :  { %374 = vmatprep.subr.mxu0 %v294_v43  ;;  %512 = vmatprep.subr.mxu1 %v439_v15  ;;  %v41_v43 = vlaneseq }
  0x34   :  { %375 = vmatpush1.msra.mxu0 %v293_v44  ;;  %513 = vmatpush1.msra.mxu1 %v438_v16 }
  0x35   :  { %376 = vmatprep.subr.mxu0 %v292_v45  ;;  %514 = vmatprep.subr.mxu1 %v437_v17  ;;  %v716_v44 = vshrl.u32 %v41_v43, 7  ;;  %v456_v43 = vld [vmem:[#allocation2 + $0x280] sm:$0xff] }
  0x36   :  { %377 = vmatpush1.msra.mxu0 %v291_v46  ;;  %515 = vmatpush1.msra.mxu1 %v436_v18  ;;  %v722_v46 = vld [vmem:[%s760_s3] sm:$0xff] }
  0x37   :  { %394 = vmatprep.subr.mxu0 %v338_v47  ;;  %516 = vmatprep.subr.mxu1 %v435_v19  ;;  %v43_v45 = vsub.s32 0, %v716_v44  ;;  %v47_v47 = vsub.s32 4, %v716_v44 }
  0x38   :  { %395 = vmatpush2.msra.mxu0 %v337_v48  ;;  %517 = vmatpush1.msra.mxu1 %v434_v20 }
  0x39   :  { %396 = vmatprep.subr.mxu0 %v336_v49  ;;  %518 = vmatprep.subr.mxu1 %v433_v21  ;;  %v44_v48 = vrot.slane %v722_v46, %v43_v45  ;;  %v48_v49 = vrot.slane %v722_v46, %v47_v47 }
  0x3a   :  { %397 = vmatpush2.msra.mxu0 %v335_v50  ;;  %519 = vmatpush1.msra.mxu1 %v432_v22 }
  0x3b   :  { %398 = vmatprep.subr.mxu0 %v334_v51  ;;  %520 = vmatprep.subr.mxu1 %v431_v23  ;;  %v54_v50 = vrot.slane %v44_v48, %v43_v45  ;;  %v245_v51 = vsub.s32 1, %v716_v44 }
  0x3c   :  { %399 = vmatpush2.msra.mxu0 %v333_v52  ;;  %521 = vmatpush1.msra.mxu1 %v430_v24  ;;  %v249_v52 = vsub.s32 5, %v716_v44 }
  0x3d   :  { %400 = vmatprep.subr.mxu0 %v332_v53  ;;  %522 = vmatprep.subr.mxu1 %v429_v25  ;;  %v58_v53 = vrot.slane %v48_v49, %v43_v45 }
  0x3e   :  { %401 = vmatpush2.msra.mxu0 %v331_v54  ;;  %523 = vmatpush1.msra.mxu1 %v428_v26 }
  0x3f   :  { %402 = vmatprep.subr.mxu0 %v330_v55  ;;  %524 = vmatprep.subr.mxu1 %v427_v27  ;;  %v267_v55 = vsub.s32 2, %v716_v44 }
  0x40   :  { %403 = vmatpush2.msra.mxu0 %v329_v56  ;;  %525 = vmatpush1.msra.mxu1 %v426_v28  ;;  %v271_v56 = vsub.s32 6, %v716_v44 }
  0x41   :  { %404 = vmatprep.subr.mxu0 %v328_v57  ;;  %526 = vmatprep.subr.mxu1 %v425_v29  ;;  %v268_v2 = vrot.slane %v722_v46, %v267_v55 }
  0x42   :  { %405 = vmatpush2.msra.mxu0 %v327_v58  ;;  %527 = vmatpush1.msra.mxu1 %v424_v30  ;;  %v272_v4 = vrot.slane %v722_v46, %v271_v56 }
  0x43   :  { %406 = vmatprep.subr.mxu0 %v326_v59  ;;  %544 = vmatprep.subr.mxu1 %v471_v31  ;;  %v246_v59 = vrot.slane %v722_v46, %v245_v51  ;;  %v278_v18 = vrot.slane %v268_v2, %v267_v55 }
  0x44   :  { %407 = vmatpush2.msra.mxu0 %v325_v60  ;;  %545 = vmatpush2.msra.mxu1 %v470_v32  ;;  %v282_v19 = vrot.slane %v272_v4, %v267_v55 }
  0x45   :  { %408 = vmatprep.subr.mxu0 %v324_v61  ;;  %546 = vmatprep.subr.mxu1 %v469_v33  ;;  %v250_v61 = vrot.slane %v722_v46, %v249_v52  ;;  %v256_v7 = vrot.slane %v246_v59, %v245_v51 }
  0x46   :  { %409 = vmatpush2.msra.mxu0 %v323_v62  ;;  %547 = vmatpush2.msra.mxu1 %v468_v34 }
  0x47   :  { %548 = vmatprep.subr.mxu1 %v467_v35  ;;  %v260_v11 = vrot.slane %v250_v61, %v245_v51  ;;  %v478_v51 = vsub.s32 7, %v716_v44 }
  0x48   :  { %549 = vmatpush2.msra.mxu1 %v466_v36 }
  0x49   :  { %550 = vmatprep.subr.mxu1 %v465_v37 }
  0x4a   :  { %551 = vmatpush2.msra.mxu1 %v464_v38 }
  0x4b   :  { %552 = vmatprep.subr.mxu1 %v463_v39 }
  0x4c   :  { %553 = vmatpush2.msra.mxu1 %v462_v40  ;;  %v459_v40 = vld [vmem:[#allocation2 + $0x298] sm:$0xff] }
  0x4d   :  { %554 = vmatprep.subr.mxu1 %v461_v41  ;;  %v458_v41 = vld [vmem:[#allocation2 + $0x290] sm:$0xff] }
  0x4e   :  { %555 = vmatpush2.msra.mxu1 %v460_v42  ;;  %v457_v42 = vld [vmem:[#allocation2 + $0x288] sm:$0xff] }
  0x4f   :  { %556 = vmatprep.subr.mxu1 %v459_v40 }
  0x50   :  { %557 = vmatpush2.msra.mxu1 %v458_v41 }
  0x51   :  { %558 = vmatprep.subr.mxu1 %v457_v42 }
  0x52   :  { %559 = vmatpush2.msra.mxu1 %v456_v43 }
  0xd5   :  { %v132_v54 = vpop.f32.mrf.mxu0 }
  0xd6   :  { %v133_v57 = vadd.f32 %v132_v54, %v54_v50  ;;  %v216_v58 = vpop.f32.mrf.mxu1 }
  0xd7   :  { %v134_v60 = vpop.f32.mrf.mxu0  ;;  %v235_v0 = vmul.f32 0.5, %v216_v58 }
  0xd8   :  { %v227_v62 = vmax.f32 %v133_v57, 0.0  ;;  %v135_v63 = vadd.f32 %v134_v60, %v58_v53  ;;  %v218_v1 = vpop.f32.mrf.mxu1 }
  0xd9   :  { %v138_v3 = vpop.f32.mrf.mxu0  ;;  %v236_v10 = vmul.f32 0.5, %v218_v1 }
  0xda   :  { %v231_v5 = vmul.f32 0.5, %v227_v62  ;;  %v228_v6 = vmax.f32 %v135_v63, 0.0  ;;  %v139_v8 = vadd.f32 %v138_v3, %v54_v50  ;;  %v222_v9 = vpop.f32.mrf.mxu1  ;;  %v474_v50 = vsub.s32 3, %v716_v44 }
  0xdb   :  { %v140_v12 = vpop.f32.mrf.mxu0  ;;  %v237_v13 = vmul.f32 0.5, %v222_v9 }
  0xdc   :  { %v232_v14 = vmul.f32 0.5, %v228_v6  ;;  %v239_v15 = vadd.f32 %v235_v0, %v231_v5  ;;  %v229_v16 = vmax.f32 %v139_v8, 0.0  ;;  %v141_v17 = vadd.f32 %v140_v12, %v58_v53  ;;  %v224_v20 = vpop.f32.mrf.mxu1 }
  0xdd   :  { %v238_v28 = vmul.f32 0.5, %v224_v20  ;;  %v475_v52 = vrot.slane %v722_v46, %v474_v50  ;;  %v479_v53 = vrot.slane %v722_v46, %v478_v51 }
  0xde   :  { %v261_v21 = vmul.f32 %v256_v7, %v239_v15  ;;  %v233_v22 = vmul.f32 0.5, %v229_v16  ;;  %v240_v23 = vadd.f32 %v236_v10, %v232_v14  ;;  %v230_v24 = vmax.f32 %v141_v17, 0.0 }
  0xdf   :  { %v485_v54 = vrot.slane %v475_v52, %v474_v50  ;;  %v489_v55 = vrot.slane %v479_v53, %v474_v50 }
  0xe0   :  { %v262_v25 = vmul.f32 %v260_v11, %v240_v23  ;;  %v234_v26 = vmul.f32 0.5, %v230_v24  ;;  %v241_v27 = vadd.f32 %v237_v13, %v233_v22  ;;  %v283_v29 = vadd.f32 %v278_v18, %v261_v21 }
  0xe2   :  { %v284_v30 = vadd.f32 %v282_v19, %v262_v25  ;;  %v263_v31 = vmul.f32 %v256_v7, %v241_v27  ;;  %v242_v32 = vadd.f32 %v238_v28, %v234_v26  ;;  %v287_v35 = vmax.f32 %v283_v29, 0.0 }
  0xe4   :  { %v288_v33 = vmax.f32 %v284_v30, 0.0  ;;  %v264_v34 = vmul.f32 %v260_v11, %v242_v32  ;;  %v285_v36 = vadd.f32 %v278_v18, %v263_v31 }
  0xe6   :  { %v286_v37 = vadd.f32 %v282_v19, %v264_v34  ;;  %608 = vmatprep.mubr.msk.f32.mxu0 %vm339_vm1, %v288_v33  ;;  %v289_v39 = vmax.f32 %v285_v36, 0.0 }
  0xe7   :  { %411 = vmatmul.mubr.f32.vlgmr.msra.gmra.mxu0 %v287_v35 }
  0xe8   :  { %v290_v38 = vmax.f32 %v286_v37, 0.0 }
  0xea   :  { %609 = vmatprep.mubr.msk.f32.mxu0 %vm339_vm1, %v290_v38 }
  0xeb   :  { %417 = vmatmul.mubr.f32.gmra.mxu0 %v289_v39 }
 0x1a7   :  { %v412_v45 = vpop.f32.mrf.mxu0 }
 0x1a8   :  { %v581_v62 = vmul.f32 0.5, %v412_v45 }
 0x1a9   :  { %v414_v47 = vpop.f32.mrf.mxu0 }
 0x1aa   :  { %610 = vmatprep.mubr.msk.f32.mxu1 %vm339_vm1, %v414_v47  ;;  %v582_v2 = vmul.f32 0.5, %v414_v47 }
 0x1ab   :  { %v418_v48 = vpop.f32.mrf.mxu0  ;;  %561 = vmatmul.mubr.f32.vlgmr.msra.gmra.mxu1 %v412_v45 }
 0x1ac   :  { %v583_v7 = vmul.f32 0.5, %v418_v48 }
 0x1ad   :  { %v420_v49 = vpop.f32.mrf.mxu0 }
 0x1ae   :  { %611 = vmatprep.mubr.msk.f32.mxu1 %vm339_vm1, %v420_v49  ;;  %v584_v10 = vmul.f32 0.5, %v420_v49 }
 0x1af   :  { %567 = vmatmul.mubr.f32.gmra.mxu1 %v418_v48 }
 0x26b   :  { %v562_v56 = vpop.f32.mrf.mxu1 }
 0x26c   :  { %v563_v57 = vadd.f32 %v562_v56, %v485_v54 }
 0x26d   :  { %v564_v58 = vpop.f32.mrf.mxu1 }
 0x26e   :  { %v573_v59 = vmax.f32 %v563_v57, 0.0  ;;  %v565_v60 = vadd.f32 %v564_v58, %v489_v55 }
 0x26f   :  { %v568_v61 = vpop.f32.mrf.mxu1 }
 0x270   :  { %v577_v63 = vmul.f32 0.5, %v573_v59  ;;  %v574_v0 = vmax.f32 %v565_v60, 0.0  ;;  %v569_v1 = vadd.f32 %v568_v61, %v485_v54 }
 0x271   :  { %v570_v3 = vpop.f32.mrf.mxu1 }
 0x272   :  { %v585_v4 = vadd.f32 %v581_v62, %v577_v63  ;;  %v578_v44 = vmul.f32 0.5, %v574_v0  ;;  %v575_v5 = vmax.f32 %v569_v1, 0.0  ;;  %v571_v6 = vadd.f32 %v570_v3, %v489_v55 }
 0x274   :  { %589 = vst [vmem:[%s761_s4] sm:$0xff] %v585_v4  ;;  %v586_v46 = vadd.f32 %v582_v2, %v578_v44  ;;  %v579_v8 = vmul.f32 0.5, %v575_v5  ;;  %v576_v9 = vmax.f32 %v571_v6, 0.0 }
 0x276   :  { %590 = vst.msk [vmem:[%s761_s4 + $0x8] sm:$0xff] %vm339_vm1, %v586_v46  ;;  %v587_v11 = vadd.f32 %v583_v7, %v579_v8  ;;  %v580_v12 = vmul.f32 0.5, %v576_v9 }
 0x278   :  { %591 = vst [vmem:[%s761_s4 + $0x10] sm:$0xff] %v587_v11  ;;  %v588_v13 = vadd.f32 %v584_v10, %v580_v12 }
 0x27a   :  { %592 = vst.msk [vmem:[%s761_s4 + $0x18] sm:$0xff] %vm339_vm1, %v588_v13 }
 0x27b   :  { %597 = vsyncpa [#allocation3], 1 }

// kernel: forward.3
= control target key start
LH: loop header
LB: loop body
LE: loop exit
PB: predicated region body
PF: predicated region fallthrough
CT: control target
= control target key end

     0   :  { %10 = vsyncpa [#allocation3], 0  ;;  %s1675_s0 = inlined_call_operand.vmem [shape: f32[2,8,192], index: 0, kind: input, shape index: {}]   ;;  %s1676_s1 = inlined_call_operand.vmem [shape: f32[192,64], index: 1, kind: input, shape index: {}]   ;;  %s1677_s2 = inlined_call_operand.vmem [shape: f32[3,192,64], index: 2, kind: input, shape index: {}]   ;;  %s1678_s3 = inlined_call_operand.vmem [shape: f32[192,10], index: 3, kind: input, shape index: {}]   ;;  %s1679_s4 = inlined_call_operand.vmem [shape: f32[4,64], index: 4, kind: input, shape index: {}]   ;;  %s1680_s5 = inlined_call_operand.hbm [shape: f32[2,8,10], index: 5, kind: output, shape index: {}]  }
   0x1   :  { %12 = vsyncpa [#allocation3 + $0x1], 0  ;;  %s1058_s18 = smov 0   ;;  %s1060_s19 = smov 0  }
   0x2   :  { %s1062_s20 = smov 0   ;;  %s1064_s21 = smov 0  }
   0x3 LB: > { %s1079_s22 = sadd.s32 4294967295, %s1023_s21   ;;  %s857_s23 = sadd.s32 4294967294, %s1023_s21   ;;  %s1023_s21 = sphi %s1064_s21, %s1686_s21   ;;  %s1019_s20 = sphi %s1062_s20, %s1685_s20   ;;  %s1015_s19 = sphi %s1060_s19, %s1684_s19   ;;  %s1011_s18 = sphi %s1058_s18, %s1683_s18  }
   0x4   : > { %s1083_s24 = sadd.s32 1, %s1023_s21   ;;  %s135_s25 = sadd.s32 1, %s1019_s20 }
   0x5   : > { %s132_s26 = ssub.s32 %s1023_s21, %s1083_s24  ;;  %p145_p0 = scmp.ne.s32.totalorder %s1019_s20, %s1015_s19 }
   0x6   : > { %p133_p1 = scmp.eq.s32.totalorder %s132_s26, 0  ;;  %p146_p2 = scmp.eq.s32.totalorder %s1079_s22, 1 }
   0x7   : > { %p151_p3 = scmp.ne.s32.totalorder %s1015_s19, %s1011_s18  ;;  %p152_p4 = scmp.eq.s32.totalorder %s857_s23, 1 }
   0x8   : > { %s1094_s27 = scalar_select %p133_p1, %s1019_s20, %s135_s25  }
   0x9   : > { %p1096_p5 = por %p146_p2, %p145_p0  ;;  %p1100_p6 = por %p152_p4, %p151_p3 }
   0xa   : > { %p860_p7 = scmp.ge.s32.totalorder %s1023_s21, 1  ;;  %p190_p8 = scmp.lt.s32.totalorder %s1023_s21, 3 }
   0xc   : > { %p191_p9 = pnand %p860_p7, %p190_p8 }
   0xd   : > { %p218_p10 = scmp.lt.s32.totalorder (!%p191_p9), %s1079_s22, 1  ;;  %s1026_s14 = smov (!%p191_p9), 64  }
   0xe   : > { %194 = sbr.rel (%p191_p9) target bundleno = 1527 (0x5f7), region = 40  ;;  %s215_s8 = sand.u32 (!%p191_p9), 1, %s1015_s19  }
   0xf   : > { %s918_s10 = sshll.u32 (!%p191_p9), %s1079_s22, 7  ;;  %s785_s16 = scalar_lea.sflag (!%p191_p9), [#allocation3], %s215_s8 }
  0x10   : > { %s1634_s15 = scalar_lea.hbm (!%p191_p9), %s1680_s5, %s918_s10 }
  0x13   : > { %v241_v0 = vld [vmem:[%s1676_s1 + $0x78] sm:$0xff]  ;;  %v1025_v1 = vmov 0.0   ;;  %v240_v2 = vld [vmem:[%s1676_s1 + $0x70] sm:$0xff]  ;;  %s219_s9 = scalar_select %p218_p10, %s1079_s22, 1  ;;  %v239_v3 = vld [vmem:[%s1676_s1 + $0x68] sm:$0xff]  ;;  %vm254_vm0 = vcmask 523264   ;;  %v250_v50 = vlaneseq }
  0x14   : > { %258 = vmatprep.subr.mxu0 %v1025_v1  ;;  %373 = vmatprep.subr.mxu1 %v1025_v1  ;;  %v238_v4 = vld [vmem:[%s1676_s1 + $0x60] sm:$0xff]  ;;  %v237_v5 = vld [vmem:[%s1676_s1 + $0x58] sm:$0xff]  ;;  %v236_v7 = vld [vmem:[%s1676_s1 + $0x50] sm:$0xff]  ;;  %vm336_vm1 = vcmask 1046528   ;;  %vm332_vm2 = vcmask 1040384   ;;  %vm451_vm3 = vcmask 1045504  }
  0x15   : > { %259 = vmatpush1.msra.mxu0 %v241_v0  ;;  %s921_s12 = sshll.u32 %s219_s9, 4  ;;  %v235_v8 = vld [vmem:[%s1676_s1 + $0x48] sm:$0xff]  ;;  %v234_v9 = vld [vmem:[%s1676_s1 + $0x40] sm:$0xff]  ;;  %v233_v10 = vld [vmem:[%s1676_s1 + $0x38] sm:$0xff]  ;;  %v1306_v51 = vshrl.u32 %v250_v50, 7  ;;  %vm447_vm4 = vcmask 1041408  }
  0x16   : > { %260 = vmatprep.subr.mxu0 %v1025_v1  ;;  %s1127_s17 = scalar_lea.vmem %s1675_s0, %s921_s12  ;;  %v232_v11 = vld [vmem:[%s1676_s1 + $0x30] sm:$0xff]  ;;  %v231_v12 = vld [vmem:[%s1676_s1 + $0x28] sm:$0xff]  ;;  %v230_v13 = vld [vmem:[%s1676_s1 + $0x20] sm:$0xff]  ;;  %s861_s9 = sshll.u32 %s215_s8, 3  ;;  %vm782_vm5 = vcmask 80896  }
  0x17   : > { %261 = vmatpush1.msra.mxu0 %v240_v2  ;;  %v224_v6 = vld [vmem:[%s1127_s17 + $0x8] sm:$0xff]  ;;  %v229_v14 = vld [vmem:[%s1676_s1 + $0x18] sm:$0xff]  ;;  %v228_v15 = vld [vmem:[%s1676_s1 + $0x10] sm:$0xff]  ;;  %v252_v53 = vsub.s32 0, %v1306_v51  ;;  %s217_s11 = scalar_lea.vmem [#allocation2], %s861_s9  ;;  %s1027_s22 = smov [#allocation2]  }
  0x18   : > { %262 = vmatprep.subr.mxu0 %v1025_v1  ;;  %864 = vmatprep.mubr.msk.f32.mxu0 %vm254_vm0, %v224_v6  ;;  %v227_v16 = vld [vmem:[%s1676_s1 + $0x8] sm:$0xff]  ;;  %v226_v17 = vld [vmem:[%s1676_s1] sm:$0xff]  ;;  %v249_v18 = vld [vmem:[%s1676_s1 + $0xb8] sm:$0xff]  ;;  %s798_s12 = sshll.u32 %s217_s11, 4  ;;  %s1636_s12 = int_to_ptr.vmem [resolvable:$true] %s798_s12 }
  0x19   : > { %263 = vmatpush1.msra.mxu0 %v239_v3  ;;  %v248_v19 = vld [vmem:[%s1676_s1 + $0xb0] sm:$0xff]  ;;  %v247_v20 = vld [vmem:[%s1676_s1 + $0xa8] sm:$0xff]  ;;  %v246_v21 = vld [vmem:[%s1676_s1 + $0xa0] sm:$0xff]  ;;  %s963_s23 = scalar_lea.vmem %s1636_s12, 128 }
  0x1a   : > { %264 = vmatprep.subr.mxu0 %v1025_v1  ;;  %v245_v22 = vld [vmem:[%s1676_s1 + $0x98] sm:$0xff]  ;;  %v244_v23 = vld [vmem:[%s1676_s1 + $0x90] sm:$0xff]  ;;  %v243_v24 = vld [vmem:[%s1676_s1 + $0x88] sm:$0xff]  ;;  %p964_p11 = scmp.ne.s32.totalorder %s1636_s12, %s963_s23 }
  0x1b   : > { %265 = vmatpush1.msra.mxu0 %v238_v4  ;;  %v242_v25 = vld [vmem:[%s1676_s1 + $0x80] sm:$0xff]  ;;  %v357_v27 = vld [vmem:[%s1677_s2 + $0x78] sm:$0xff]  ;;  %v356_v28 = vld [vmem:[%s1677_s2 + $0x70] sm:$0xff] }
  0x1c   : > { %266 = vmatprep.subr.mxu0 %v1025_v1  ;;  %v223_v26 = vld [vmem:[%s1127_s17] sm:$0xff]  ;;  %374 = vmatpush1.msra.mxu1 %v357_v27  ;;  %v355_v29 = vld [vmem:[%s1677_s2 + $0x68] sm:$0xff]  ;;  %v353_v31 = vld [vmem:[%s1677_s2 + $0x58] sm:$0xff]  ;;  %v368_v27 = vsub.s32 1, %v1306_v51  ;;  %p965_p12 = pnand %p964_p11, %p1096_p5  ;;  %s967_s17 = sshll.u32 %s1027_s22, 4  ;;  %s968_s17 = int_to_ptr.vmem [resolvable:$false] %s967_s17 }
  0x1d   : > { %267 = vmatpush1.msra.mxu0 %v237_v5  ;;  %375 = vmatprep.subr.mxu1 %v1025_v1  ;;  %v354_v30 = vld [vmem:[%s1677_s2 + $0x60] sm:$0xff]  ;;  %v352_v32 = vld [vmem:[%s1677_s2 + $0x50] sm:$0xff]  ;;  %v351_v33 = vld [vmem:[%s1677_s2 + $0x48] sm:$0xff]  ;;  %s969_s25 = scalar_lea.vmem %s968_s17, 256  ;;  %p970_p0 = scmp.lt.s32.totalorder %s1636_s12, %s968_s17 }
  0x1e   : > { %268 = vmatprep.subr.mxu0 %v1025_v1  ;;  %376 = vmatpush1.msra.mxu1 %v356_v28  ;;  %v350_v34 = vld [vmem:[%s1677_s2 + $0x40] sm:$0xff]  ;;  %v349_v35 = vld [vmem:[%s1677_s2 + $0x38] sm:$0xff]  ;;  %v348_v36 = vld [vmem:[%s1677_s2 + $0x30] sm:$0xff]  ;;  %p966_p13 = pneg %p965_p12  ;;  %p971_p1 = scmp.lt.s32.totalorder %s969_s25, %s963_s23 }
  0x1f   : > { %269 = vmatpush1.msra.mxu0 %v236_v7  ;;  %377 = vmatprep.subr.mxu1 %v1025_v1  ;;  %v347_v37 = vld [vmem:[%s1677_s2 + $0x28] sm:$0xff]  ;;  %v346_v38 = vld [vmem:[%s1677_s2 + $0x20] sm:$0xff]  ;;  %v345_v39 = vld [vmem:[%s1677_s2 + $0x18] sm:$0xff] }
  0x20   : > { %270 = vmatprep.subr.mxu0 %v1025_v1  ;;  %378 = vmatpush1.msra.mxu1 %v355_v29  ;;  %v344_v40 = vld [vmem:[%s1677_s2 + $0x10] sm:$0xff]  ;;  %v343_v41 = vld [vmem:[%s1677_s2 + $0x8] sm:$0xff]  ;;  %v342_v42 = vld [vmem:[%s1677_s2] sm:$0xff]  ;;  %p972_p2 = por %p971_p1, %p970_p0 }
  0x21   : > { %271 = vmatpush1.msra.mxu0 %v235_v8  ;;  %379 = vmatprep.subr.mxu1 %v1025_v1  ;;  %v365_v43 = vld [vmem:[%s1677_s2 + $0xb8] sm:$0xff]  ;;  %v364_v44 = vld [vmem:[%s1677_s2 + $0xb0] sm:$0xff]  ;;  %v363_v45 = vld [vmem:[%s1677_s2 + $0xa8] sm:$0xff] }
  0x22   : > { %272 = vmatprep.subr.mxu0 %v1025_v1  ;;  %380 = vmatpush1.msra.mxu1 %v354_v30  ;;  %v362_v46 = vld [vmem:[%s1677_s2 + $0xa0] sm:$0xff]  ;;  %v361_v47 = vld [vmem:[%s1677_s2 + $0x98] sm:$0xff]  ;;  %v360_v48 = vld [vmem:[%s1677_s2 + $0x90] sm:$0xff]  ;;  %p973_p3 = pnand %p972_p2, %p966_p13 }
  0x23   : > { %273 = vmatpush1.msra.mxu0 %v234_v9  ;;  %381 = vmatprep.subr.mxu1 %v1025_v1  ;;  %v359_v49 = vld [vmem:[%s1677_s2 + $0x88] sm:$0xff]  ;;  %v358_v52 = vld [vmem:[%s1677_s2 + $0x80] sm:$0xff]  ;;  %v881_v3 = vld [vmem:[%s1677_s2 + $0x138] sm:$0xff] }
  0x24   : > { %274 = vmatprep.subr.mxu0 %v1025_v1  ;;  %382 = vmatpush1.msra.mxu1 %v353_v31  ;;  %v1316_v54 = vld [vmem:[%s1679_s4] sm:$0xf]  ;;  %v880_v4 = vld [vmem:[%s1677_s2 + $0x130] sm:$0xff]  ;;  %v879_v5 = vld [vmem:[%s1677_s2 + $0x128] sm:$0xff] }
  0x25   : > { %275 = vmatpush1.msra.mxu0 %v233_v10  ;;  %383 = vmatprep.subr.mxu1 %v1025_v1  ;;  %v253_v55 = vrot.slane %v1316_v54, %v252_v53  ;;  %v878_v6 = vld [vmem:[%s1677_s2 + $0x120] sm:$0xff]  ;;  %v877_v7 = vld [vmem:[%s1677_s2 + $0x118] sm:$0xff]  ;;  %v876_v8 = vld [vmem:[%s1677_s2 + $0x110] sm:$0xff]  ;;  %v369_v28 = vrot.slane %v1316_v54, %v368_v27 }
  0x26   : > { %276 = vmatprep.subr.mxu0 %v1025_v1  ;;  %384 = vmatpush1.msra.mxu1 %v352_v32  ;;  %v875_v9 = vld [vmem:[%s1677_s2 + $0x108] sm:$0xff]  ;;  %v874_v10 = vld [vmem:[%s1677_s2 + $0x100] sm:$0xff]  ;;  %v893_v53 = vld [vmem:[%s1677_s2 + $0x190] sm:$0xff] }
  0x27   : > { %277 = vmatpush1.msra.mxu0 %v232_v11  ;;  %385 = vmatprep.subr.mxu1 %v1025_v1  ;;  %v873_v11 = vld [vmem:[%s1677_s2 + $0xf8] sm:$0xff]  ;;  %v895_v50 = vld [vmem:[%s1677_s2 + $0x1a0] sm:$0xff]  ;;  %v687_v27 = vld [vmem:[%s1678_s3 + $0x10] sm:$0xff] }
  0x28   : > { %278 = vmatprep.subr.mxu0 %v1025_v1  ;;  %386 = vmatpush1.msra.mxu1 %v351_v33 }
  0x29   : > { %279 = vmatpush1.msra.mxu0 %v231_v12  ;;  %387 = vmatprep.subr.mxu1 %v1025_v1  ;;  %v872_v12 = vld [vmem:[%s1677_s2 + $0xf0] sm:$0xff] }
  0x2a   : > { %280 = vmatprep.subr.mxu0 %v1025_v1  ;;  %388 = vmatpush1.msra.mxu1 %v350_v34 }
  0x2b   : > { %281 = vmatpush1.msra.mxu0 %v230_v13  ;;  %389 = vmatprep.subr.mxu1 %v1025_v1  ;;  %v871_v13 = vld [vmem:[%s1677_s2 + $0xe8] sm:$0xff] }
  0x2c   : > { %282 = vmatprep.subr.mxu0 %v1025_v1  ;;  %390 = vmatpush1.msra.mxu1 %v349_v35 }
  0x2d   : > { %283 = vmatpush1.msra.mxu0 %v229_v14  ;;  %391 = vmatprep.subr.mxu1 %v1025_v1  ;;  %v870_v14 = vld [vmem:[%s1677_s2 + $0xe0] sm:$0xff] }
  0x2e   : > { %284 = vmatprep.subr.mxu0 %v1025_v1  ;;  %392 = vmatpush1.msra.mxu1 %v348_v36 }
  0x2f   : > { %285 = vmatpush1.msra.mxu0 %v228_v15  ;;  %393 = vmatprep.subr.mxu1 %v1025_v1  ;;  %v869_v15 = vld [vmem:[%s1677_s2 + $0xd8] sm:$0xff] }
  0x30   : > { %286 = vmatprep.subr.mxu0 %v1025_v1  ;;  %394 = vmatpush1.msra.mxu1 %v347_v37 }
  0x31   : > { %287 = vmatpush1.msra.mxu0 %v227_v16  ;;  %395 = vmatprep.subr.mxu1 %v1025_v1  ;;  %v868_v16 = vld [vmem:[%s1677_s2 + $0xd0] sm:$0xff] }
  0x32   : > { %288 = vmatprep.subr.mxu0 %v1025_v1  ;;  %396 = vmatpush1.msra.mxu1 %v346_v38 }
  0x33   : > { %289 = vmatpush1.msra.mxu0 %v226_v17  ;;  %397 = vmatprep.subr.mxu1 %v1025_v1  ;;  %v867_v17 = vld [vmem:[%s1677_s2 + $0xc8] sm:$0xff] }
  0x34   : > { %306 = vmatprep.subr.mxu0 %v1025_v1  ;;  %398 = vmatpush1.msra.mxu1 %v345_v39  ;;  %v906_v39 = vld [vmem:[%s1677_s2 + $0x1f8] sm:$0xff] }
  0x35   : > { %307 = vmatpush2.msra.mxu0 %v249_v18  ;;  %399 = vmatprep.subr.mxu1 %v1025_v1  ;;  %v866_v18 = vld [vmem:[%s1677_s2 + $0xc0] sm:$0xff] }
  0x36   : > { %308 = vmatprep.subr.mxu0 %v1025_v1  ;;  %400 = vmatpush1.msra.mxu1 %v344_v40  ;;  %v905_v40 = vld [vmem:[%s1677_s2 + $0x1f0] sm:$0xff] }
  0x37   : > { %309 = vmatpush2.msra.mxu0 %v248_v19  ;;  %401 = vmatprep.subr.mxu1 %v1025_v1  ;;  %v889_v19 = vld [vmem:[%s1677_s2 + $0x178] sm:$0xff] }
  0x38   : > { %310 = vmatprep.subr.mxu0 %v1025_v1  ;;  %402 = vmatpush1.msra.mxu1 %v343_v41  ;;  %v904_v41 = vld [vmem:[%s1677_s2 + $0x1e8] sm:$0xff] }
  0x39   : > { %311 = vmatpush2.msra.mxu0 %v247_v20  ;;  %403 = vmatprep.subr.mxu1 %v1025_v1  ;;  %v888_v20 = vld [vmem:[%s1677_s2 + $0x170] sm:$0xff] }
  0x3a   : > { %312 = vmatprep.subr.mxu0 %v1025_v1  ;;  %404 = vmatpush1.msra.mxu1 %v342_v42  ;;  %v903_v42 = vld [vmem:[%s1677_s2 + $0x1e0] sm:$0xff] }
  0x3b   : > { %313 = vmatpush2.msra.mxu0 %v246_v21  ;;  %421 = vmatprep.subr.mxu1 %v1025_v1  ;;  %v887_v21 = vld [vmem:[%s1677_s2 + $0x168] sm:$0xff] }
  0x3c   : > { %314 = vmatprep.subr.mxu0 %v1025_v1  ;;  %422 = vmatpush2.msra.mxu1 %v365_v43  ;;  %v902_v43 = vld [vmem:[%s1677_s2 + $0x1d8] sm:$0xff] }
  0x3d   : > { %315 = vmatpush2.msra.mxu0 %v245_v22  ;;  %423 = vmatprep.subr.mxu1 %v1025_v1  ;;  %v886_v22 = vld [vmem:[%s1677_s2 + $0x160] sm:$0xff] }
  0x3e   : > { %316 = vmatprep.subr.mxu0 %v1025_v1  ;;  %424 = vmatpush2.msra.mxu1 %v364_v44  ;;  %v901_v44 = vld [vmem:[%s1677_s2 + $0x1d0] sm:$0xff] }
  0x3f   : > { %317 = vmatpush2.msra.mxu0 %v244_v23  ;;  %425 = vmatprep.subr.mxu1 %v1025_v1  ;;  %v885_v23 = vld [vmem:[%s1677_s2 + $0x158] sm:$0xff] }
  0x40   : > { %318 = vmatprep.subr.mxu0 %v1025_v1  ;;  %426 = vmatpush2.msra.mxu1 %v363_v45  ;;  %v900_v45 = vld [vmem:[%s1677_s2 + $0x1c8] sm:$0xff] }
  0x41   : > { %319 = vmatpush2.msra.mxu0 %v243_v24  ;;  %427 = vmatprep.subr.mxu1 %v1025_v1  ;;  %v884_v24 = vld [vmem:[%s1677_s2 + $0x150] sm:$0xff] }
  0x42   : > { %320 = vmatprep.subr.mxu0 %v1025_v1  ;;  %428 = vmatpush2.msra.mxu1 %v362_v46  ;;  %v899_v46 = vld [vmem:[%s1677_s2 + $0x1c0] sm:$0xff] }
  0x43   : > { %321 = vmatpush2.msra.mxu0 %v242_v25  ;;  %429 = vmatprep.subr.mxu1 %v1025_v1  ;;  %v883_v25 = vld [vmem:[%s1677_s2 + $0x148] sm:$0xff] }
  0x44   : > { %323 = vmatmul.mubr.f32.vlgmr.msra.gmra.mxu0 %v223_v26  ;;  %489 = vmatprep.subr.mxu0 %v1025_v1  ;;  %v882_v26 = vld [vmem:[%s1677_s2 + $0x140] sm:$0xff] }
  0x45   : > { %430 = vmatpush2.msra.mxu1 %v361_v47  ;;  %490 = vmatpush1.msra.mxu0 %v881_v3  ;;  %v898_v47 = vld [vmem:[%s1677_s2 + $0x1b8] sm:$0xff] }
  0x46   : > { %431 = vmatprep.subr.mxu1 %v1025_v1  ;;  %491 = vmatprep.subr.mxu0 %v1025_v1 }
  0x47   : > { %432 = vmatpush2.msra.mxu1 %v360_v48  ;;  %492 = vmatpush1.msra.mxu0 %v880_v4  ;;  %v897_v48 = vld [vmem:[%s1677_s2 + $0x1b0] sm:$0xff] }
  0x48   : > { %433 = vmatprep.subr.mxu1 %v1025_v1  ;;  %493 = vmatprep.subr.mxu0 %v1025_v1 }
  0x49   : > { %434 = vmatpush2.msra.mxu1 %v359_v49  ;;  %494 = vmatpush1.msra.mxu0 %v879_v5  ;;  %v896_v49 = vld [vmem:[%s1677_s2 + $0x1a8] sm:$0xff] }
  0x4a   : > { %435 = vmatprep.subr.mxu1 %v1025_v1  ;;  %495 = vmatprep.subr.mxu0 %v1025_v1 }
  0x4b   : > { %436 = vmatpush2.msra.mxu1 %v358_v52  ;;  %496 = vmatpush1.msra.mxu0 %v878_v6  ;;  %v894_v52 = vld [vmem:[%s1677_s2 + $0x198] sm:$0xff] }
  0x4c   : > { %603 = vmatprep.subr.mxu1 %v1025_v1  ;;  %497 = vmatprep.subr.mxu0 %v1025_v1 }
  0x4d   : > { %498 = vmatpush1.msra.mxu0 %v877_v7 }
  0x4e   : > { %499 = vmatprep.subr.mxu0 %v1025_v1 }
  0x4f   : > { %500 = vmatpush1.msra.mxu0 %v876_v8 }
  0x50   : > { %501 = vmatprep.subr.mxu0 %v1025_v1 }
  0x51   : > { %502 = vmatpush1.msra.mxu0 %v875_v9 }
  0x52   : > { %503 = vmatprep.subr.mxu0 %v1025_v1 }
  0x53   : > { %504 = vmatpush1.msra.mxu0 %v874_v10 }
  0x54   : > { %505 = vmatprep.subr.mxu0 %v1025_v1 }
  0x55   : > { %506 = vmatpush1.msra.mxu0 %v873_v11 }
  0x56   : > { %507 = vmatprep.subr.mxu0 %v1025_v1 }
  0x57   : > { %508 = vmatpush1.msra.mxu0 %v872_v12 }
  0x58   : > { %509 = vmatprep.subr.mxu0 %v1025_v1 }
  0x59   : > { %510 = vmatpush1.msra.mxu0 %v871_v13 }
  0x5a   : > { %511 = vmatprep.subr.mxu0 %v1025_v1 }
  0x5b   : > { %512 = vmatpush1.msra.mxu0 %v870_v14  ;;  %v700_v14 = vld [vmem:[%s1678_s3 + $0x78] sm:$0xff] }
  0x5c   : > { %513 = vmatprep.subr.mxu0 %v1025_v1 }
  0x5d   : > { %514 = vmatpush1.msra.mxu0 %v869_v15  ;;  %v699_v15 = vld [vmem:[%s1678_s3 + $0x70] sm:$0xff] }
  0x5e   : > { %515 = vmatprep.subr.mxu0 %v1025_v1 }
  0x5f   : > { %516 = vmatpush1.msra.mxu0 %v868_v16  ;;  %v698_v16 = vld [vmem:[%s1678_s3 + $0x68] sm:$0xff] }
  0x60   : > { %517 = vmatprep.subr.mxu0 %v1025_v1 }
  0x61   : > { %518 = vmatpush1.msra.mxu0 %v867_v17  ;;  %v697_v17 = vld [vmem:[%s1678_s3 + $0x60] sm:$0xff] }
  0x62   : > { %519 = vmatprep.subr.mxu0 %v1025_v1 }
  0x63   : > { %520 = vmatpush1.msra.mxu0 %v866_v18  ;;  %v696_v18 = vld [vmem:[%s1678_s3 + $0x58] sm:$0xff] }
  0x64   : > { %537 = vmatprep.subr.mxu0 %v1025_v1 }
  0x65   : > { %538 = vmatpush2.msra.mxu0 %v889_v19  ;;  %v695_v19 = vld [vmem:[%s1678_s3 + $0x50] sm:$0xff] }
  0x66   : > { %539 = vmatprep.subr.mxu0 %v1025_v1 }
  0x67   : > { %540 = vmatpush2.msra.mxu0 %v888_v20  ;;  %v694_v20 = vld [vmem:[%s1678_s3 + $0x48] sm:$0xff] }
  0x68   : > { %541 = vmatprep.subr.mxu0 %v1025_v1 }
  0x69   : > { %542 = vmatpush2.msra.mxu0 %v887_v21  ;;  %v693_v21 = vld [vmem:[%s1678_s3 + $0x40] sm:$0xff] }
  0x6a   : > { %543 = vmatprep.subr.mxu0 %v1025_v1 }
  0x6b   : > { %544 = vmatpush2.msra.mxu0 %v886_v22  ;;  %v692_v22 = vld [vmem:[%s1678_s3 + $0x38] sm:$0xff] }
  0x6c   : > { %545 = vmatprep.subr.mxu0 %v1025_v1 }
  0x6d   : > { %546 = vmatpush2.msra.mxu0 %v885_v23  ;;  %v691_v23 = vld [vmem:[%s1678_s3 + $0x30] sm:$0xff] }
  0x6e   : > { %547 = vmatprep.subr.mxu0 %v1025_v1 }
  0x6f   : > { %548 = vmatpush2.msra.mxu0 %v884_v24  ;;  %v690_v24 = vld [vmem:[%s1678_s3 + $0x28] sm:$0xff] }
  0x70   : > { %549 = vmatprep.subr.mxu0 %v1025_v1 }
  0x71   : > { %550 = vmatpush2.msra.mxu0 %v883_v25  ;;  %v689_v25 = vld [vmem:[%s1678_s3 + $0x20] sm:$0xff] }
  0x72   : > { %551 = vmatprep.subr.mxu0 %v1025_v1 }
  0x73   : > { %552 = vmatpush2.msra.mxu0 %v882_v26  ;;  %v688_v26 = vld [vmem:[%s1678_s3 + $0x18] sm:$0xff] }
  0x74   : > { %712 = vmatprep.subr.mxu0 %v1025_v1 }
 0x104   : > { %v324_v56 = vpop.f32.mrf.mxu0 }
 0x105   : > { %v325_v57 = vadd.f32 %v324_v56, %v253_v55  ;;  %v892_v55 = vld [vmem:[%s1677_s2 + $0x188] sm:$0xff]  ;;  %v891_v56 = vld [vmem:[%s1677_s2 + $0x180] sm:$0xff] }
 0x106   : > { %v326_v58 = vpop.f32.mrf.mxu0 }
 0x107   : > { %v328_v59 = vmax.f32 %v325_v57, 0.0  ;;  %v914_v57 = vld [vmem:[%s1677_s2 + $0x238] sm:$0xff]  ;;  %v913_v58 = vld [vmem:[%s1677_s2 + $0x230] sm:$0xff] }
 0x109   : > { %338 = vrot.lane.b32.xlu0 %v328_v59, %s1026_s14  ;;  %v334_v60 = vrot.slane %v328_v59, 1  ;;  %v330_v62 = vrot.slane %v328_v59, 7  ;;  %v912_v59 = vld [vmem:[%s1677_s2 + $0x228] sm:$0xff] }
 0x10b   : > { %v337_v61 = vsel %vm336_vm1, %v334_v60, 0.0  ;;  %v333_v0 = vsel %vm332_vm2, 0.0, %v330_v62  ;;  %v911_v60 = vld [vmem:[%s1677_s2 + $0x220] sm:$0xff]  ;;  %v909_v62 = vld [vmem:[%s1677_s2 + $0x210] sm:$0xff] }
 0x10c   : > { %865 = vmatprep.mubr.msk.f32.mxu1 %vm254_vm0, %v337_v61  ;;  %v910_v61 = vld [vmem:[%s1677_s2 + $0x218] sm:$0xff] }
 0x17b   : > { %v339_v63 = vpop.permute.xlu0 %338 }
 0x17c   : > { %v341_v2 = vsel %vm254_vm0, %v333_v0, %v339_v63  ;;  %v908_v63 = vld [vmem:[%s1677_s2 + $0x208] sm:$0xff]  ;;  %v907_v0 = vld [vmem:[%s1677_s2 + $0x200] sm:$0xff] }
 0x17d   : > { %438 = vmatmul.mubr.f32.vlgmr.msra.gmra.mxu1 %v341_v2  ;;  %v484_v2 = vsub.s32 2, %v1306_v51 }
 0x17e   : > { %604 = vmatpush1.msra.mxu1 %v906_v39 }
 0x17f   : > { %605 = vmatprep.subr.mxu1 %v1025_v1  ;;  %v485_v3 = vrot.slane %v1316_v54, %v484_v2 }
 0x180   : > { %606 = vmatpush1.msra.mxu1 %v905_v40 }
 0x181   : > { %607 = vmatprep.subr.mxu1 %v1025_v1 }
 0x182   : > { %608 = vmatpush1.msra.mxu1 %v904_v41 }
 0x183   : > { %609 = vmatprep.subr.mxu1 %v1025_v1 }
 0x184   : > { %610 = vmatpush1.msra.mxu1 %v903_v42 }
 0x185   : > { %611 = vmatprep.subr.mxu1 %v1025_v1 }
 0x186   : > { %612 = vmatpush1.msra.mxu1 %v902_v43 }
 0x187   : > { %613 = vmatprep.subr.mxu1 %v1025_v1 }
 0x188   : > { %614 = vmatpush1.msra.mxu1 %v901_v44 }
 0x189   : > { %615 = vmatprep.subr.mxu1 %v1025_v1 }
 0x18a   : > { %616 = vmatpush1.msra.mxu1 %v900_v45 }
 0x18b   : > { %617 = vmatprep.subr.mxu1 %v1025_v1 }
 0x18c   : > { %618 = vmatpush1.msra.mxu1 %v899_v46 }
 0x18d   : > { %619 = vmatprep.subr.mxu1 %v1025_v1 }
 0x18e   : > { %620 = vmatpush1.msra.mxu1 %v898_v47 }
 0x18f   : > { %621 = vmatprep.subr.mxu1 %v1025_v1 }
 0x190   : > { %622 = vmatpush1.msra.mxu1 %v897_v48 }
 0x191   : > { %623 = vmatprep.subr.mxu1 %v1025_v1 }
 0x192   : > { %624 = vmatpush1.msra.mxu1 %v896_v49 }
 0x193   : > { %625 = vmatprep.subr.mxu1 %v1025_v1 }
 0x194   : > { %626 = vmatpush1.msra.mxu1 %v895_v50 }
 0x195   : > { %627 = vmatprep.subr.mxu1 %v1025_v1 }
 0x196   : > { %628 = vmatpush1.msra.mxu1 %v894_v52 }
 0x197   : > { %629 = vmatprep.subr.mxu1 %v1025_v1 }
 0x198   : > { %630 = vmatpush1.msra.mxu1 %v893_v53 }
 0x199   : > { %631 = vmatprep.subr.mxu1 %v1025_v1 }
 0x19a   : > { %632 = vmatpush1.msra.mxu1 %v892_v55 }
 0x19b   : > { %633 = vmatprep.subr.mxu1 %v1025_v1 }
 0x19c   : > { %634 = vmatpush1.msra.mxu1 %v891_v56 }
 0x19d   : > { %651 = vmatprep.subr.mxu1 %v1025_v1 }
 0x19e   : > { %652 = vmatpush2.msra.mxu1 %v914_v57 }
 0x19f   : > { %653 = vmatprep.subr.mxu1 %v1025_v1 }
 0x1a0   : > { %654 = vmatpush2.msra.mxu1 %v913_v58 }
 0x1a1   : > { %655 = vmatprep.subr.mxu1 %v1025_v1 }
 0x1a2   : > { %656 = vmatpush2.msra.mxu1 %v912_v59 }
 0x1a3   : > { %657 = vmatprep.subr.mxu1 %v1025_v1 }
 0x1a4   : > { %658 = vmatpush2.msra.mxu1 %v911_v60 }
 0x1a5   : > { %659 = vmatprep.subr.mxu1 %v1025_v1 }
 0x1a6   : > { %660 = vmatpush2.msra.mxu1 %v910_v61 }
 0x1a7   : > { %661 = vmatprep.subr.mxu1 %v1025_v1 }
 0x1a8   : > { %662 = vmatpush2.msra.mxu1 %v909_v62 }
 0x1a9   : > { %663 = vmatprep.subr.mxu1 %v1025_v1 }
 0x1aa   : > { %664 = vmatpush2.msra.mxu1 %v908_v63 }
 0x1ab   : > { %665 = vmatprep.subr.mxu1 %v1025_v1 }
 0x1ac   : > { %666 = vmatpush2.msra.mxu1 %v907_v0 }
 0x23d   : > { %v439_v29 = vpop.f32.mrf.mxu1 }
 0x23e   : > { %v440_v30 = vadd.f32 %v439_v29, %v369_v28  ;;  %v686_v28 = vld [vmem:[%s1678_s3 + $0x8] sm:$0xff]  ;;  %v685_v29 = vld [vmem:[%s1678_s3] sm:$0xff] }
 0x23f   : > { %v441_v31 = vpop.f32.mrf.mxu1 }
 0x240   : > { %v443_v32 = vmax.f32 %v440_v30, 0.0  ;;  %v708_v30 = vld [vmem:[%s1678_s3 + $0xb8] sm:$0xff]  ;;  %v707_v31 = vld [vmem:[%s1678_s3 + $0xb0] sm:$0xff] }
 0x242   : > { %453 = vrot.lane.b32.xlu0 %v443_v32, %s1026_s14  ;;  %v449_v33 = vrot.slane %v443_v32, 2  ;;  %v445_v35 = vrot.slane %v443_v32, 6  ;;  %v706_v32 = vld [vmem:[%s1678_s3 + $0xa8] sm:$0xff] }
 0x244   : > { %v452_v34 = vsel %vm451_vm3, %v449_v33, 0.0  ;;  %v448_v37 = vsel %vm447_vm4, 0.0, %v445_v35  ;;  %v705_v33 = vld [vmem:[%s1678_s3 + $0xa0] sm:$0xff]  ;;  %v703_v35 = vld [vmem:[%s1678_s3 + $0x90] sm:$0xff] }
 0x245   : > { %890 = vmatprep.mubr.msk.f32.mxu0 %vm254_vm0, %v452_v34  ;;  %v704_v34 = vld [vmem:[%s1678_s3 + $0x98] sm:$0xff] }
 0x2b4   : > { %v454_v36 = vpop.permute.xlu0 %453 }
 0x2b5   : > { %v456_v38 = vsel %vm254_vm0, %v448_v37, %v454_v36  ;;  %v702_v36 = vld [vmem:[%s1678_s3 + $0x88] sm:$0xff]  ;;  %v701_v37 = vld [vmem:[%s1678_s3 + $0x80] sm:$0xff] }
 0x2b6   : > { %554 = vmatmul.mubr.f32.vlgmr.msra.gmra.mxu0 %v456_v38  ;;  %v598_v38 = vsub.s32 3, %v1306_v51 }
 0x2b7   : > { %713 = vmatpush1.msra.mxu0 %v700_v14 }
 0x2b8   : > { %714 = vmatprep.subr.mxu0 %v1025_v1  ;;  %v599_v39 = vrot.slane %v1316_v54, %v598_v38 }
 0x2b9   : > { %715 = vmatpush1.msra.mxu0 %v699_v15 }
 0x2ba   : > { %716 = vmatprep.subr.mxu0 %v1025_v1 }
 0x2bb   : > { %717 = vmatpush1.msra.mxu0 %v698_v16 }
 0x2bc   : > { %718 = vmatprep.subr.mxu0 %v1025_v1 }
 0x2bd   : > { %719 = vmatpush1.msra.mxu0 %v697_v17 }
 0x2be   : > { %720 = vmatprep.subr.mxu0 %v1025_v1 }
 0x2bf   : > { %721 = vmatpush1.msra.mxu0 %v696_v18 }
 0x2c0   : > { %722 = vmatprep.subr.mxu0 %v1025_v1 }
 0x2c1   : > { %723 = vmatpush1.msra.mxu0 %v695_v19 }
 0x2c2   : > { %724 = vmatprep.subr.mxu0 %v1025_v1 }
 0x2c3   : > { %725 = vmatpush1.msra.mxu0 %v694_v20 }
 0x2c4   : > { %726 = vmatprep.subr.mxu0 %v1025_v1 }
 0x2c5   : > { %727 = vmatpush1.msra.mxu0 %v693_v21 }
 0x2c6   : > { %728 = vmatprep.subr.mxu0 %v1025_v1 }
 0x2c7   : > { %729 = vmatpush1.msra.mxu0 %v692_v22 }
 0x2c8   : > { %730 = vmatprep.subr.mxu0 %v1025_v1 }
 0x2c9   : > { %731 = vmatpush1.msra.mxu0 %v691_v23 }
 0x2ca   : > { %732 = vmatprep.subr.mxu0 %v1025_v1 }
 0x2cb   : > { %733 = vmatpush1.msra.mxu0 %v690_v24 }
 0x2cc   : > { %734 = vmatprep.subr.mxu0 %v1025_v1 }
 0x2cd   : > { %735 = vmatpush1.msra.mxu0 %v689_v25 }
 0x2ce   : > { %736 = vmatprep.subr.mxu0 %v1025_v1 }
 0x2cf   : > { %737 = vmatpush1.msra.mxu0 %v688_v26 }
 0x2d0   : > { %738 = vmatprep.subr.mxu0 %v1025_v1 }
 0x2d1   : > { %739 = vmatpush1.msra.mxu0 %v687_v27 }
 0x2d2   : > { %740 = vmatprep.subr.mxu0 %v1025_v1 }
 0x2d3   : > { %741 = vmatpush1.msra.mxu0 %v686_v28 }
 0x2d4   : > { %742 = vmatprep.subr.mxu0 %v1025_v1 }
 0x2d5   : > { %743 = vmatpush1.msra.mxu0 %v685_v29 }
 0x2d6   : > { %760 = vmatprep.subr.mxu0 %v1025_v1 }
 0x2d7   : > { %761 = vmatpush2.msra.mxu0 %v708_v30 }
 0x2d8   : > { %762 = vmatprep.subr.mxu0 %v1025_v1 }
 0x2d9   : > { %763 = vmatpush2.msra.mxu0 %v707_v31 }
 0x2da   : > { %764 = vmatprep.subr.mxu0 %v1025_v1 }
 0x2db   : > { %765 = vmatpush2.msra.mxu0 %v706_v32 }
 0x2dc   : > { %766 = vmatprep.subr.mxu0 %v1025_v1 }
 0x2dd   : > { %767 = vmatpush2.msra.mxu0 %v705_v33 }
 0x2de   : > { %768 = vmatprep.subr.mxu0 %v1025_v1 }
 0x2df   : > { %769 = vmatpush2.msra.mxu0 %v704_v34 }
 0x2e0   : > { %770 = vmatprep.subr.mxu0 %v1025_v1 }
 0x2e1   : > { %771 = vmatpush2.msra.mxu0 %v703_v35 }
 0x2e2   : > { %772 = vmatprep.subr.mxu0 %v1025_v1 }
 0x2e3   : > { %773 = vmatpush2.msra.mxu0 %v702_v36 }
 0x2e4   : > { %774 = vmatprep.subr.mxu0 %v1025_v1 }
 0x2e5   : > { %775 = vmatpush2.msra.mxu0 %v701_v37 }
 0x376   : > { %v555_v4 = vpop.f32.mrf.mxu0 }
 0x377   : > { %v556_v5 = vadd.f32 %v555_v4, %v485_v3 }
 0x378   : > { %v557_v6 = vpop.f32.mrf.mxu0 }
 0x379   : > { %v559_v7 = vmax.f32 %v556_v5, 0.0 }
 0x37b   : > { %567 = vrot.lane.b32.xlu1 %v559_v7, %s1026_s14  ;;  %v564_v8 = vrot.slane %v559_v7, 2  ;;  %v561_v10 = vrot.slane %v559_v7, 6 }
 0x37d   : > { %v566_v9 = vsel %vm451_vm3, %v564_v8, 0.0  ;;  %v563_v12 = vsel %vm447_vm4, 0.0, %v561_v10 }
 0x37e   : > { %915 = vmatprep.mubr.msk.f32.mxu1 %vm254_vm0, %v566_v9 }
 0x3ed   : > { %v568_v11 = vpop.permute.xlu1 %567 }
 0x3ee   : > { %v570_v13 = vsel %vm254_vm0, %v563_v12, %v568_v11 }
 0x3ef   : > { %668 = vmatmul.mubr.f32.vlgmr.msra.gmra.mxu1 %v570_v13 }
 0x4af   : > { %v669_v40 = vpop.f32.mrf.mxu1 }
 0x4b0   : > { %v670_v41 = vadd.f32 %v669_v40, %v599_v39 }
 0x4b1   : > { %v671_v42 = vpop.f32.mrf.mxu1 }
 0x4b2   : > { %v673_v43 = vmax.f32 %v670_v41, 0.0 }
 0x4b4   : > { %681 = vrot.lane.b32.xlu1 %v673_v43, %s1026_s14  ;;  %v678_v44 = vrot.slane %v673_v43, 2  ;;  %v675_v45 = vrot.slane %v673_v43, 6 }
 0x4b6   : > { %v680_v1 = vsel %vm451_vm3, %v678_v44, 0.0  ;;  %v677_v47 = vsel %vm447_vm4, 0.0, %v675_v45 }
 0x4b7   : > { %916 = vmatprep.mubr.msk.f32.mxu0 %vm254_vm0, %v680_v1 }
 0x526   : > { %v682_v46 = vpop.permute.xlu1 %681 }
 0x527   : > { %v684_v51 = vsel %vm254_vm0, %v677_v47, %v682_v46 }
 0x528   : > { %777 = vmatmul.mubr.f32.vlgmr.msra.gmra.mxu0 %v684_v51 }
 0x5e8   : > { %v778_v54 = vpop.f32.mrf.mxu0 }
 0x5e9   : > { %783 = vst.msk [vmem:[%s217_s11] sm:$0xff] %vm782_vm5, %v778_v54 }
 0x5ea   : > { %v780_v48 = vpop.f32.mrf.mxu0 }
 0x5eb   : > { %976 = shalt.err (!%p973_p3)
}
 0x5ec   : > { %s977_s26 = scalar_lea.hbm %s1634_s15, 128  ;;  %s981_s7 = scalar_lea.hbm %s1680_s5, 256 }
 0x5ed   : > { %p978_p4 = scmp.ne.s32.totalorder %s1634_s15, %s977_s26  ;;  %p982_p9 = scmp.lt.s32.totalorder %s1634_s15, %s1680_s5 }
 0x5ee   : > { %p983_p10 = scmp.lt.s32.totalorder %s981_s7, %s977_s26 }
 0x5ef   : > { %p979_p7 = pnand %p978_p4, %p1096_p5 }
 0x5f0   : > { %p984_p11 = por %p983_p10, %p982_p9 }
 0x5f1   : > { %p980_p8 = pneg %p979_p7 }
 0x5f3   : > { %p985_p12 = pnand %p984_p11, %p980_p8 }
 0x5f5   : > { %988 = shalt.err (!%p985_p12)
}
 0x5f6   : > { %922 = dma.vmem_to_hbm [thread:$0]  (%p1096_p5), %s1636_s12, 128, %s1634_s15, %s785_s16  }
 0x5f7 PF: > { %p928_p13 = scmp.ge.s32.totalorder %s1023_s21, 2  ;;  %s810_s10 = sand.u32 1, %s1011_s18  }
 0x5f8   : > { %s811_s11 = scalar_lea.sflag [#allocation3], %s810_s10 }
 0x5f9   : > { %p925_p0 = pnand %p928_p13, %p1100_p6 }
 0x5fb   : > { %p926_p1 = pneg %p925_p0 }
 0x5fd   : > { %1006 = dma.done.wait (%p926_p1), %s811_s11, 128  }
 0x5fe   : > { %1008 = vsyncadd (%p926_p1), %s811_s11, 4294967168  ;;  %p15_p2 = scmp.ge.s32.totalorder %s1083_s24, 4   ;;  %s1683_s18 = smov %s1015_s19 }
 0x5ff   : > { %s1684_s19 = smov %s1019_s20  ;;  %s1685_s20 = smov %s1094_s27 }
 0x600   : > { %s1686_s21 = smov %s1083_s24  ;;  %17 = sbr.rel (!%p15_p2) target bundleno = 3 (0x3), region = 77 }
 0x605   :  { %816 = vsyncpa [#allocation3], 1 }
 0x606   :  { %818 = vsyncpa [#allocation3 + $0x1], 1 }

</bundles_post_ra>
